<compile_context>
chip_gen: v6e
topology: v6e:2x2x1
jax: 0.10.0
libtpu: 0.0.40
codegen_flags: <defaults>
</compile_context>

<pallas_src>
import functools
import math

import jax
import jax.numpy as jnp
from jax.experimental import pallas as pl
from jax.experimental.pallas import tpu as pltpu

BN_EPS = 1e-5
LANE = 128          # TPU vreg lane width
TILE_M = 256        # rows of the lane-packed LHS per grid step (bf16-friendly)


# ----------------------------------------------------------------------------
# Pallas kernels
# ----------------------------------------------------------------------------
def _matmul_core(x_ref, w_ref, s_ref, t_ref, *, relu_in):
    x = x_ref[...]                       # bf16 tile
    if relu_in:
        x = jnp.maximum(x, 0)            # fused prologue ReLU (resblock entry)
    acc = jnp.dot(x, w_ref[...], preferred_element_type=jnp.float32)
    return acc * s_ref[...] + t_ref[...]  # f32 epilogue (BN fold)


def _fused_kernel(x_ref, w_ref, s_ref, t_ref, o_ref, *, relu_in, relu_out):
    acc = _matmul_core(x_ref, w_ref, s_ref, t_ref, relu_in=relu_in)
    if relu_out:
        acc = jnp.maximum(acc, 0.0)
    o_ref[...] = acc.astype(o_ref.dtype)


def _fused_res_kernel(x_ref, w_ref, s_ref, t_ref, r_ref, o_ref, *,
                      relu_in, relu_out):
    acc = _matmul_core(x_ref, w_ref, s_ref, t_ref, relu_in=relu_in)
    acc = acc + r_ref[...].astype(jnp.float32)
    if relu_out:
        acc = jnp.maximum(acc, 0.0)
    o_ref[...] = acc.astype(o_ref.dtype)


def fused_matmul(x, w, scale, shift, *, relu_in=False, relu_out=False,
                 residual=None, out_dtype=jnp.bfloat16):
    """out = maybe_relu((maybe_relu(x) @ w) * scale + shift [+ residual]).

    Lane-dense packing: when N < 128, g = 128 // N logical rows are packed per
    physical row via a block-diagonal weight, so the MXU output and the vector
    stores are full-lane (128 wide).  The packing of x / residual / output is a
    row-major-compatible reshape (free); only the weight is expanded.
    """
    M, K = x.shape
    _, N = w.shape

    g = 1
    if N < LANE and LANE % N == 0 and M % (LANE // N) == 0:
        g = LANE // N
    Mp, Kp, Np = M // g, K * g, N * g

    xp = x.reshape(Mp, Kp).astype(jnp.bfloat16)
    if g > 1:
        wp = jnp.kron(jnp.eye(g, dtype=jnp.float32), w.astype(jnp.float32))
        sp = jnp.tile(scale.reshape(1, N), (1, g))
        tp = jnp.tile(shift.reshape(1, N), (1, g))
    else:
        wp, sp, tp = w, scale.reshape(1, N), shift.reshape(1, N)
    wp = wp.astype(jnp.bfloat16)
    sp = sp.astype(jnp.float32)
    tp = tp.astype(jnp.float32)

    rp = None
    if residual is not None:
        rp = residual.reshape(Mp, Np).astype(jnp.bfloat16)

    # M tiling (grid axis 0, "parallel": both TensorCores on v7x, pipelined DMA
    # on all chips).  Tiles are sized well under the v7x 64 MiB VMEM budget.
    if Mp <= TILE_M:
        tm, grid_m, mp_pad = Mp, 1, Mp
    else:
        tm = TILE_M
        grid_m = pl.cdiv(Mp, tm)
        mp_pad = grid_m * tm
        if mp_pad != Mp:
            xp = jnp.pad(xp, ((0, mp_pad - Mp), (0, 0)))
            if rp is not None:
                rp = jnp.pad(rp, ((0, mp_pad - Mp), (0, 0)))

    in_specs = [
        pl.BlockSpec((tm, Kp), lambda i: (i, 0)),
        pl.BlockSpec((Kp, Np), lambda i: (0, 0)),
        pl.BlockSpec((1, Np), lambda i: (0, 0)),
        pl.BlockSpec((1, Np), lambda i: (0, 0)),
    ]
    args = [xp, wp, sp, tp]
    if rp is None:
        kernel = functools.partial(_fused_kernel,
                                   relu_in=relu_in, relu_out=relu_out)
    else:
        kernel = functools.partial(_fused_res_kernel,
                                   relu_in=relu_in, relu_out=relu_out)
        in_specs.append(pl.BlockSpec((tm, Np), lambda i: (i, 0)))
        args.append(rp)

    bytes_accessed = 2 * (mp_pad * Kp + Kp * Np + mp_pad * Np) + 8 * Np
    if rp is not None:
        bytes_accessed += 2 * mp_pad * Np
    cost = pl.CostEstimate(flops=2 * mp_pad * Kp * Np, transcendentals=0,
                           bytes_accessed=bytes_accessed)

    out = pl.pallas_call(
        kernel,
        out_shape=jax.ShapeDtypeStruct((mp_pad, Np), out_dtype),
        grid=(grid_m,),
        in_specs=in_specs,
        out_specs=pl.BlockSpec((tm, Np), lambda i: (i, 0)),
        compiler_params=pltpu.CompilerParams(
            dimension_semantics=("parallel",)),
        cost_estimate=cost,
    )(*args)

    if mp_pad != Mp:
        out = out[:Mp]
    return out.reshape(M, N)


# ----------------------------------------------------------------------------
# Plain-JAX glue: im2col patch extraction (pure data movement, bf16)
# ----------------------------------------------------------------------------
def extract_patches(x, kh, kw, stride, pad):
    """x: (B, H, W, C) -> patches (B*Ho*Wo, kh*kw*C), spatial dims (B, Ho, Wo)."""
    # TODO(synk): the patch gather is still materialized by XLA in HBM (taps
    # duplicated); an in-kernel gather via an index_map over NHWC windows would
    # remove that extra DMA traffic at production resolutions.
    x = x.astype(jnp.bfloat16)            # halve HBM bytes of the im2col slab
    if pad:
        x = jnp.pad(x, ((0, 0), (pad, pad), (pad, pad), (0, 0)))
    B, Hp, Wp, C = x.shape
    Ho = (Hp - kh) // stride + 1
    Wo = (Wp - kw) // stride + 1
    cols = []
    for i in range(kh):
        for j in range(kw):
            cols.append(x[:, i:i + stride * Ho:stride, j:j + stride * Wo:stride, :])
    patches = jnp.concatenate(cols, axis=-1)  # (B, Ho, Wo, kh*kw*C)
    return patches.reshape(B * Ho * Wo, kh * kw * C), (B, Ho, Wo)


def _bn_fold(bias, bn):
    """Fold conv bias + BN(inference) into a per-channel (scale, shift), f32."""
    if bn is None:
        return jnp.ones_like(bias), bias
    gamma, beta, mean, var = bn
    s = gamma / jnp.sqrt(var + BN_EPS)
    t = bias * s + beta - mean * s
    return s, t


def conv_bn_act(x_nhwc, w, bias, bn, kh, kw, stride, pad, *,
                relu_out, relu_in=False, out_dtype=jnp.bfloat16):
    """Conv2d [+ BN] [+ ReLU in/out] via im2col + one fused Pallas matmul."""
    patches, (B, Ho, Wo) = extract_patches(x_nhwc, kh, kw, stride, pad)
    cin, cout = w.shape[2], w.shape[3]
    wmat = w.reshape(kh * kw * cin, cout)
    s, t = _bn_fold(bias, bn)
    out = fused_matmul(patches, wmat, s, t, relu_in=relu_in,
                       relu_out=relu_out, out_dtype=out_dtype)
    return out.reshape(B, Ho, Wo, cout)


def resblock(x_nhwc, p, *, out_dtype=jnp.bfloat16):
    """x + BN(Conv1x1(ReLU(BN(Conv3x3(ReLU(x)))))).

    Both ReLUs, the BN folds and the residual add all live inside the two
    fused Pallas kernels (no standalone activation passes)."""
    B, H, W, C = x_nhwc.shape
    h = conv_bn_act(x_nhwc, p["w1"], p["b1"], p["bn1"], 3, 3, 1, 1,
                    relu_out=True, relu_in=True)
    wmat = p["w2"].reshape(C, C)
    s, t = _bn_fold(p["b2"], p["bn2"])
    out = fused_matmul(h.reshape(B * H * W, C), wmat, s, t,
                       residual=x_nhwc.reshape(B * H * W, C),
                       out_dtype=out_dtype)
    return out.reshape(B, H, W, C)


# ----------------------------------------------------------------------------
# Deterministic parameter construction (synthetic; shapes from __init__)
# ----------------------------------------------------------------------------
def _conv_params(key, kh, kw, cin, cout):
    k1, k2 = jax.random.split(key)
    fan_in = kh * kw * cin
    bound = 1.0 / math.sqrt(fan_in)
    w = jax.random.uniform(k1, (kh, kw, cin, cout), jnp.float32, -bound, bound)
    b = jax.random.uniform(k2, (cout,), jnp.float32, -bound, bound)
    return w, b


def _bn_params(key, c):
    k1, k2, k3, k4 = jax.random.split(key, 4)
    gamma = 1.0 + 0.1 * jax.random.normal(k1, (c,), jnp.float32)
    beta = 0.1 * jax.random.normal(k2, (c,), jnp.float32)
    mean = 0.1 * jax.random.normal(k3, (c,), jnp.float32)
    var = 1.0 + 0.1 * jax.random.uniform(k4, (c,), jnp.float32)
    return gamma, beta, mean, var


def _resblock_params(key, dim):
    ks = jax.random.split(key, 4)
    w1, b1 = _conv_params(ks[0], 3, 3, dim, dim)
    bn1 = _bn_params(ks[1], dim)
    w2, b2 = _conv_params(ks[2], 1, 1, dim, dim)
    bn2 = _bn_params(ks[3], dim)
    return {"w1": w1, "b1": b1, "bn1": bn1, "w2": w2, "b2": b2, "bn2": bn2}


def init_encoder_params(key, dim_z, num_class, num_rb, flg_bn=True):
    n_class = int(math.ceil(num_class / 2) * 2)
    ks = jax.random.split(key, 8 + num_rb)
    params = {"res": []}
    params["conv1_w"], params["conv1_b"] = _conv_params(ks[0], 4, 4, n_class, dim_z // 2)
    params["conv1_bn"] = _bn_params(ks[1], dim_z // 2) if flg_bn else None
    params["conv2_w"], params["conv2_b"] = _conv_params(ks[2], 4, 4, dim_z // 2, dim_z)
    params["conv2_bn"] = _bn_params(ks[3], dim_z) if flg_bn else None
    params["conv3_w"], params["conv3_b"] = _conv_params(ks[4], 4, 4, dim_z, dim_z)
    for i in range(num_rb - 1):
        params["res"].append(_resblock_params(ks[5 + i], dim_z))
    params["res_m"] = _resblock_params(ks[5 + (num_rb - 1)], dim_z)
    return params, n_class


# ----------------------------------------------------------------------------
# Forward pass (flg_var_q=False -> returns mu only)
# ----------------------------------------------------------------------------
def encoder_forward(x_labels, params, n_class):
    # F.one_hot(x).permute(0,3,1,2) in NCHW == channels-last one_hot in NHWC
    x_one_hot = jax.nn.one_hot(x_labels, n_class, dtype=jnp.float32)  # (B,H,W,nc)
    h = conv_bn_act(x_one_hot, params["conv1_w"], params["conv1_b"],
                    params["conv1_bn"], 4, 4, 2, 1, relu_out=True)
    h = conv_bn_act(h, params["conv2_w"], params["conv2_b"],
                    params["conv2_bn"], 4, 4, 2, 1, relu_out=True)
    h = conv_bn_act(h, params["conv3_w"], params["conv3_b"],
                    None, 4, 4, 2, 1, relu_out=False)
    for rb in params["res"]:
        h = resblock(h, rb)
    mu = resblock(h, params["res_m"], out_dtype=jnp.float32)
    # NHWC result; NCHW equivalent is mu.transpose(0, 3, 1, 2)
    return mu


if __name__ == "__main__":
    # Small config consistent with the module: dim_z=32, num_class=8, num_rb=2
    dim_z, num_class, num_rb = 32, 8, 2
    B, H, W = 2, 16, 16

    key = jax.random.PRNGKey(0)
    k_params, k_input = jax.random.split(key)
    params, n_class = init_encoder_params(k_params, dim_z, num_class, num_rb)

    x = jax.random.randint(k_input, (B, H, W), 0, n_class, dtype=jnp.int32)

    fwd = jax.jit(lambda xi: encoder_forward(xi, params, n_class))
    mu = fwd(x)
    jax.block_until_ready(mu)

    assert mu.shape == (B, H // 8, W // 8, dim_z), mu.shape
    assert jnp.all(jnp.isfinite(mu))
    print("KERNEL_OK")
</pallas_src>

<mosaic_0001>
module attributes {stable_mosaic.version = 11 : i64} {
  func.func @_fused_kernel(%arg0: i32, %arg1: memref<16x1024xbf16, #tpu.memory_space<vmem>>, %arg2: memref<1024x128xbf16, #tpu.memory_space<vmem>>, %arg3: memref<1x128xf32, #tpu.memory_space<vmem>>, %arg4: memref<1x128xf32, #tpu.memory_space<vmem>>, %arg5: memref<16x128xbf16, #tpu.memory_space<vmem>>) attributes {dimension_semantics = [#tpu.dimension_semantics<parallel>], iteration_bounds = array<i64: 1>, scalar_prefetch = 0 : i64, scratch_operands = 0 : i64, tpu.core_type = #tpu.core_type<tc>, window_params = [{transform_indices = @transform_0, window_bounds = array<i64: 16, 1024>}, {pipeline_mode = #tpu.pipeline_mode<synchronous>, transform_indices = @transform_1, window_bounds = array<i64: 1024, 128>}, {pipeline_mode = #tpu.pipeline_mode<synchronous>, transform_indices = @transform_2, window_bounds = array<i64: 1, 128>}, {pipeline_mode = #tpu.pipeline_mode<synchronous>, transform_indices = @transform_3, window_bounds = array<i64: 1, 128>}, {transform_indices = @transform_4, window_bounds = array<i64: 16, 128>}]} {
    %c0 = arith.constant 0 : index
    %c0_0 = arith.constant 0 : index
    %0 = vector.load %arg1[%c0, %c0_0] : memref<16x1024xbf16, #tpu.memory_space<vmem>>, vector<16x1024xbf16>
    %c0_1 = arith.constant 0 : index
    %c0_2 = arith.constant 0 : index
    %1 = vector.load %arg2[%c0_1, %c0_2] : memref<1024x128xbf16, #tpu.memory_space<vmem>>, vector<1024x128xbf16>
    %cst = arith.constant dense<0.000000e+00> : vector<16x128xf32>
    %2 = tpu.matmul %0, %1, %cst {dimension_numbers = #tpu.dot_dimension_numbers<[1], [0], [0], [1], [0, 0, 1, 1], [], []>} : vector<16x1024xbf16>, vector<1024x128xbf16>, vector<16x128xf32> -> vector<16x128xf32>
    %c0_3 = arith.constant 0 : index
    %c0_4 = arith.constant 0 : index
    %3 = vector.load %arg3[%c0_3, %c0_4] : memref<1x128xf32, #tpu.memory_space<vmem>>, vector<1x128xf32>
    %4 = vector.broadcast %3 : vector<1x128xf32> to vector<16x128xf32>
    %5 = arith.mulf %2, %4 : vector<16x128xf32>
    %c0_5 = arith.constant 0 : index
    %c0_6 = arith.constant 0 : index
    %6 = vector.load %arg4[%c0_5, %c0_6] : memref<1x128xf32, #tpu.memory_space<vmem>>, vector<1x128xf32>
    %7 = vector.broadcast %6 : vector<1x128xf32> to vector<16x128xf32>
    %8 = arith.addf %5, %7 : vector<16x128xf32>
    %cst_7 = arith.constant 0.000000e+00 : f32
    %9 = vector.broadcast %cst_7 : f32 to vector<16x128xf32>
    %10 = arith.maximumf %8, %9 : vector<16x128xf32>
    %11 = arith.truncf %10 : vector<16x128xf32> to vector<16x128xbf16>
    %c0_8 = arith.constant 0 : index
    %c0_9 = arith.constant 0 : index
    %12 = vector.load %arg5[%c0_8, %c0_9] : memref<16x128xbf16, #tpu.memory_space<vmem>>, vector<16x128xbf16>
    tpu.vector_store %arg5[%c0_8, %c0_9], %11 {strides = array<i32>} : memref<16x128xbf16, #tpu.memory_space<vmem>>, vector<16x128xbf16>,
    return
  }
  func.func @transform_0(%arg0: i32) -> (i32, i32) {
    %c0_i32 = arith.constant 0 : i32
    %c0_i32_0 = arith.constant 0 : i32
    return %arg0, %c0_i32 : i32, i32
  }
  func.func @transform_1(%arg0: i32) -> (i32, i32) {
    %c0_i32 = arith.constant 0 : i32
    %c0_i32_0 = arith.constant 0 : i32
    %c0_i32_1 = arith.constant 0 : i32
    return %c0_i32, %c0_i32_0 : i32, i32
  }
  func.func @transform_2(%arg0: i32) -> (i32, i32) {
    %c0_i32 = arith.constant 0 : i32
    %c0_i32_0 = arith.constant 0 : i32
    %c0_i32_1 = arith.constant 0 : i32
    return %c0_i32, %c0_i32_0 : i32, i32
  }
  func.func @transform_3(%arg0: i32) -> (i32, i32) {
    %c0_i32 = arith.constant 0 : i32
    %c0_i32_0 = arith.constant 0 : i32
    %c0_i32_1 = arith.constant 0 : i32
    return %c0_i32, %c0_i32_0 : i32, i32
  }
  func.func @transform_4(%arg0: i32) -> (i32, i32) {
    %c0_i32 = arith.constant 0 : i32
    %c0_i32_0 = arith.constant 0 : i32
    return %arg0, %c0_i32 : i32, i32
  }
}

module attributes {stable_mosaic.version = 11 : i64} {
  func.func @_fused_kernel(%arg0: i32, %arg1: memref<8x1024xbf16, #tpu.memory_space<vmem>>, %arg2: memref<1024x128xbf16, #tpu.memory_space<vmem>>, %arg3: memref<1x128xf32, #tpu.memory_space<vmem>>, %arg4: memref<1x128xf32, #tpu.memory_space<vmem>>, %arg5: memref<8x128xbf16, #tpu.memory_space<vmem>>) attributes {dimension_semantics = [#tpu.dimension_semantics<parallel>], iteration_bounds = array<i64: 1>, scalar_prefetch = 0 : i64, scratch_operands = 0 : i64, tpu.core_type = #tpu.core_type<tc>, window_params = [{transform_indices = @transform_0, window_bounds = array<i64: 8, 1024>}, {pipeline_mode = #tpu.pipeline_mode<synchronous>, transform_indices = @transform_1, window_bounds = array<i64: 1024, 128>}, {pipeline_mode = #tpu.pipeline_mode<synchronous>, transform_indices = @transform_2, window_bounds = array<i64: 1, 128>}, {pipeline_mode = #tpu.pipeline_mode<synchronous>, transform_indices = @transform_3, window_bounds = array<i64: 1, 128>}, {transform_indices = @transform_4, window_bounds = array<i64: 8, 128>}]} {
    %c0 = arith.constant 0 : index
    %c0_0 = arith.constant 0 : index
    %0 = vector.load %arg1[%c0, %c0_0] : memref<8x1024xbf16, #tpu.memory_space<vmem>>, vector<8x1024xbf16>
    %c0_1 = arith.constant 0 : index
    %c0_2 = arith.constant 0 : index
    %1 = vector.load %arg2[%c0_1, %c0_2] : memref<1024x128xbf16, #tpu.memory_space<vmem>>, vector<1024x128xbf16>
    %cst = arith.constant dense<0.000000e+00> : vector<8x128xf32>
    %2 = tpu.matmul %0, %1, %cst {dimension_numbers = #tpu.dot_dimension_numbers<[1], [0], [0], [1], [0, 0, 1, 1], [], []>} : vector<8x1024xbf16>, vector<1024x128xbf16>, vector<8x128xf32> -> vector<8x128xf32>
    %c0_3 = arith.constant 0 : index
    %c0_4 = arith.constant 0 : index
    %3 = vector.load %arg3[%c0_3, %c0_4] : memref<1x128xf32, #tpu.memory_space<vmem>>, vector<1x128xf32>
    %4 = vector.broadcast %3 : vector<1x128xf32> to vector<8x128xf32>
    %5 = arith.mulf %2, %4 : vector<8x128xf32>
    %c0_5 = arith.constant 0 : index
    %c0_6 = arith.constant 0 : index
    %6 = vector.load %arg4[%c0_5, %c0_6] : memref<1x128xf32, #tpu.memory_space<vmem>>, vector<1x128xf32>
    %7 = vector.broadcast %6 : vector<1x128xf32> to vector<8x128xf32>
    %8 = arith.addf %5, %7 : vector<8x128xf32>
    %cst_7 = arith.constant 0.000000e+00 : f32
    %9 = vector.broadcast %cst_7 : f32 to vector<8x128xf32>
    %10 = arith.maximumf %8, %9 : vector<8x128xf32>
    %11 = arith.truncf %10 : vector<8x128xf32> to vector<8x128xbf16>
    %c0_8 = arith.constant 0 : index
    %c0_9 = arith.constant 0 : index
    %12 = vector.load %arg5[%c0_8, %c0_9] : memref<8x128xbf16, #tpu.memory_space<vmem>>, vector<8x128xbf16>
    tpu.vector_store %arg5[%c0_8, %c0_9], %11 {strides = array<i32>} : memref<8x128xbf16, #tpu.memory_space<vmem>>, vector<8x128xbf16>,
    return
  }
  func.func @transform_0(%arg0: i32) -> (i32, i32) {
    %c0_i32 = arith.constant 0 : i32
    %c0_i32_0 = arith.constant 0 : i32
    return %arg0, %c0_i32 : i32, i32
  }
  func.func @transform_1(%arg0: i32) -> (i32, i32) {
    %c0_i32 = arith.constant 0 : i32
    %c0_i32_0 = arith.constant 0 : i32
    %c0_i32_1 = arith.constant 0 : i32
    return %c0_i32, %c0_i32_0 : i32, i32
  }
  func.func @transform_2(%arg0: i32) -> (i32, i32) {
    %c0_i32 = arith.constant 0 : i32
    %c0_i32_0 = arith.constant 0 : i32
    %c0_i32_1 = arith.constant 0 : i32
    return %c0_i32, %c0_i32_0 : i32, i32
  }
  func.func @transform_3(%arg0: i32) -> (i32, i32) {
    %c0_i32 = arith.constant 0 : i32
    %c0_i32_0 = arith.constant 0 : i32
    %c0_i32_1 = arith.constant 0 : i32
    return %c0_i32, %c0_i32_0 : i32, i32
  }
  func.func @transform_4(%arg0: i32) -> (i32, i32) {
    %c0_i32 = arith.constant 0 : i32
    %c0_i32_0 = arith.constant 0 : i32
    return %arg0, %c0_i32 : i32, i32
  }
}

module attributes {stable_mosaic.version = 11 : i64} {
  func.func @_fused_kernel(%arg0: i32, %arg1: memref<2x2048xbf16, #tpu.memory_space<vmem>>, %arg2: memref<2048x128xbf16, #tpu.memory_space<vmem>>, %arg3: memref<1x128xf32, #tpu.memory_space<vmem>>, %arg4: memref<1x128xf32, #tpu.memory_space<vmem>>, %arg5: memref<2x128xbf16, #tpu.memory_space<vmem>>) attributes {dimension_semantics = [#tpu.dimension_semantics<parallel>], iteration_bounds = array<i64: 1>, scalar_prefetch = 0 : i64, scratch_operands = 0 : i64, tpu.core_type = #tpu.core_type<tc>, window_params = [{transform_indices = @transform_0, window_bounds = array<i64: 2, 2048>}, {pipeline_mode = #tpu.pipeline_mode<synchronous>, transform_indices = @transform_1, window_bounds = array<i64: 2048, 128>}, {pipeline_mode = #tpu.pipeline_mode<synchronous>, transform_indices = @transform_2, window_bounds = array<i64: 1, 128>}, {pipeline_mode = #tpu.pipeline_mode<synchronous>, transform_indices = @transform_3, window_bounds = array<i64: 1, 128>}, {transform_indices = @transform_4, window_bounds = array<i64: 2, 128>}]} {
    %c0 = arith.constant 0 : index
    %c0_0 = arith.constant 0 : index
    %0 = vector.load %arg1[%c0, %c0_0] : memref<2x2048xbf16, #tpu.memory_space<vmem>>, vector<2x2048xbf16>
    %c0_1 = arith.constant 0 : index
    %c0_2 = arith.constant 0 : index
    %1 = vector.load %arg2[%c0_1, %c0_2] : memref<2048x128xbf16, #tpu.memory_space<vmem>>, vector<2048x128xbf16>
    %cst = arith.constant dense<0.000000e+00> : vector<2x128xf32>
    %2 = tpu.matmul %0, %1, %cst {dimension_numbers = #tpu.dot_dimension_numbers<[1], [0], [0], [1], [0, 0, 1, 1], [], []>} : vector<2x2048xbf16>, vector<2048x128xbf16>, vector<2x128xf32> -> vector<2x128xf32>
    %c0_3 = arith.constant 0 : index
    %c0_4 = arith.constant 0 : index
    %3 = vector.load %arg3[%c0_3, %c0_4] : memref<1x128xf32, #tpu.memory_space<vmem>>, vector<1x128xf32>
    %4 = vector.broadcast %3 : vector<1x128xf32> to vector<2x128xf32>
    %5 = arith.mulf %2, %4 : vector<2x128xf32>
    %c0_5 = arith.constant 0 : index
    %c0_6 = arith.constant 0 : index
    %6 = vector.load %arg4[%c0_5, %c0_6] : memref<1x128xf32, #tpu.memory_space<vmem>>, vector<1x128xf32>
    %7 = vector.broadcast %6 : vector<1x128xf32> to vector<2x128xf32>
    %8 = arith.addf %5, %7 : vector<2x128xf32>
    %9 = arith.truncf %8 : vector<2x128xf32> to vector<2x128xbf16>
    %c0_7 = arith.constant 0 : index
    %c0_8 = arith.constant 0 : index
    %10 = vector.load %arg5[%c0_7, %c0_8] : memref<2x128xbf16, #tpu.memory_space<vmem>>, vector<2x128xbf16>
    tpu.vector_store %arg5[%c0_7, %c0_8], %9 {strides = array<i32>} : memref<2x128xbf16, #tpu.memory_space<vmem>>, vector<2x128xbf16>,
    return
  }
  func.func @transform_0(%arg0: i32) -> (i32, i32) {
    %c0_i32 = arith.constant 0 : i32
    %c0_i32_0 = arith.constant 0 : i32
    return %arg0, %c0_i32 : i32, i32
  }
  func.func @transform_1(%arg0: i32) -> (i32, i32) {
    %c0_i32 = arith.constant 0 : i32
    %c0_i32_0 = arith.constant 0 : i32
    %c0_i32_1 = arith.constant 0 : i32
    return %c0_i32, %c0_i32_0 : i32, i32
  }
  func.func @transform_2(%arg0: i32) -> (i32, i32) {
    %c0_i32 = arith.constant 0 : i32
    %c0_i32_0 = arith.constant 0 : i32
    %c0_i32_1 = arith.constant 0 : i32
    return %c0_i32, %c0_i32_0 : i32, i32
  }
  func.func @transform_3(%arg0: i32) -> (i32, i32) {
    %c0_i32 = arith.constant 0 : i32
    %c0_i32_0 = arith.constant 0 : i32
    %c0_i32_1 = arith.constant 0 : i32
    return %c0_i32, %c0_i32_0 : i32, i32
  }
  func.func @transform_4(%arg0: i32) -> (i32, i32) {
    %c0_i32 = arith.constant 0 : i32
    %c0_i32_0 = arith.constant 0 : i32
    return %arg0, %c0_i32 : i32, i32
  }
}

module attributes {stable_mosaic.version = 11 : i64} {
  func.func @_fused_kernel(%arg0: i32, %arg1: memref<2x1152xbf16, #tpu.memory_space<vmem>>, %arg2: memref<1152x128xbf16, #tpu.memory_space<vmem>>, %arg3: memref<1x128xf32, #tpu.memory_space<vmem>>, %arg4: memref<1x128xf32, #tpu.memory_space<vmem>>, %arg5: memref<2x128xbf16, #tpu.memory_space<vmem>>) attributes {dimension_semantics = [#tpu.dimension_semantics<parallel>], iteration_bounds = array<i64: 1>, scalar_prefetch = 0 : i64, scratch_operands = 0 : i64, tpu.core_type = #tpu.core_type<tc>, window_params = [{transform_indices = @transform_0, window_bounds = array<i64: 2, 1152>}, {pipeline_mode = #tpu.pipeline_mode<synchronous>, transform_indices = @transform_1, window_bounds = array<i64: 1152, 128>}, {pipeline_mode = #tpu.pipeline_mode<synchronous>, transform_indices = @transform_2, window_bounds = array<i64: 1, 128>}, {pipeline_mode = #tpu.pipeline_mode<synchronous>, transform_indices = @transform_3, window_bounds = array<i64: 1, 128>}, {transform_indices = @transform_4, window_bounds = array<i64: 2, 128>}]} {
    %c0 = arith.constant 0 : index
    %c0_0 = arith.constant 0 : index
    %0 = vector.load %arg1[%c0, %c0_0] : memref<2x1152xbf16, #tpu.memory_space<vmem>>, vector<2x1152xbf16>
    %cst = arith.constant 0.000000e+00 : bf16
    %1 = vector.broadcast %cst : bf16 to vector<2x1152xbf16>
    %2 = arith.maximumf %0, %1 : vector<2x1152xbf16>
    %c0_1 = arith.constant 0 : index
    %c0_2 = arith.constant 0 : index
    %3 = vector.load %arg2[%c0_1, %c0_2] : memref<1152x128xbf16, #tpu.memory_space<vmem>>, vector<1152x128xbf16>
    %cst_3 = arith.constant dense<0.000000e+00> : vector<2x128xf32>
    %4 = tpu.matmul %2, %3, %cst_3 {dimension_numbers = #tpu.dot_dimension_numbers<[1], [0], [0], [1], [0, 0, 1, 1], [], []>} : vector<2x1152xbf16>, vector<1152x128xbf16>, vector<2x128xf32> -> vector<2x128xf32>
    %c0_4 = arith.constant 0 : index
    %c0_5 = arith.constant 0 : index
    %5 = vector.load %arg3[%c0_4, %c0_5] : memref<1x128xf32, #tpu.memory_space<vmem>>, vector<1x128xf32>
    %6 = vector.broadcast %5 : vector<1x128xf32> to vector<2x128xf32>
    %7 = arith.mulf %4, %6 : vector<2x128xf32>
    %c0_6 = arith.constant 0 : index
    %c0_7 = arith.constant 0 : index
    %8 = vector.load %arg4[%c0_6, %c0_7] : memref<1x128xf32, #tpu.memory_space<vmem>>, vector<1x128xf32>
    %9 = vector.broadcast %8 : vector<1x128xf32> to vector<2x128xf32>
    %10 = arith.addf %7, %9 : vector<2x128xf32>
    %cst_8 = arith.constant 0.000000e+00 : f32
    %11 = vector.broadcast %cst_8 : f32 to vector<2x128xf32>
    %12 = arith.maximumf %10, %11 : vector<2x128xf32>
    %13 = arith.truncf %12 : vector<2x128xf32> to vector<2x128xbf16>
    %c0_9 = arith.constant 0 : index
    %c0_10 = arith.constant 0 : index
    %14 = vector.load %arg5[%c0_9, %c0_10] : memref<2x128xbf16, #tpu.memory_space<vmem>>, vector<2x128xbf16>
    tpu.vector_store %arg5[%c0_9, %c0_10], %13 {strides = array<i32>} : memref<2x128xbf16, #tpu.memory_space<vmem>>, vector<2x128xbf16>,
    return
  }
  func.func @transform_0(%arg0: i32) -> (i32, i32) {
    %c0_i32 = arith.constant 0 : i32
    %c0_i32_0 = arith.constant 0 : i32
    return %arg0, %c0_i32 : i32, i32
  }
  func.func @transform_1(%arg0: i32) -> (i32, i32) {
    %c0_i32 = arith.constant 0 : i32
    %c0_i32_0 = arith.constant 0 : i32
    %c0_i32_1 = arith.constant 0 : i32
    return %c0_i32, %c0_i32_0 : i32, i32
  }
  func.func @transform_2(%arg0: i32) -> (i32, i32) {
    %c0_i32 = arith.constant 0 : i32
    %c0_i32_0 = arith.constant 0 : i32
    %c0_i32_1 = arith.constant 0 : i32
    return %c0_i32, %c0_i32_0 : i32, i32
  }
  func.func @transform_3(%arg0: i32) -> (i32, i32) {
    %c0_i32 = arith.constant 0 : i32
    %c0_i32_0 = arith.constant 0 : i32
    %c0_i32_1 = arith.constant 0 : i32
    return %c0_i32, %c0_i32_0 : i32, i32
  }
  func.func @transform_4(%arg0: i32) -> (i32, i32) {
    %c0_i32 = arith.constant 0 : i32
    %c0_i32_0 = arith.constant 0 : i32
    return %arg0, %c0_i32 : i32, i32
  }
}

module attributes {stable_mosaic.version = 11 : i64} {
  func.func @_fused_res_kernel(%arg0: i32, %arg1: memref<2x128xbf16, #tpu.memory_space<vmem>>, %arg2: memref<128x128xbf16, #tpu.memory_space<vmem>>, %arg3: memref<1x128xf32, #tpu.memory_space<vmem>>, %arg4: memref<1x128xf32, #tpu.memory_space<vmem>>, %arg5: memref<2x128xbf16, #tpu.memory_space<vmem>>, %arg6: memref<2x128xbf16, #tpu.memory_space<vmem>>) attributes {dimension_semantics = [#tpu.dimension_semantics<parallel>], iteration_bounds = array<i64: 1>, scalar_prefetch = 0 : i64, scratch_operands = 0 : i64, tpu.core_type = #tpu.core_type<tc>, window_params = [{transform_indices = @transform_0, window_bounds = array<i64: 2, 128>}, {pipeline_mode = #tpu.pipeline_mode<synchronous>, transform_indices = @transform_1, window_bounds = array<i64: 128, 128>}, {pipeline_mode = #tpu.pipeline_mode<synchronous>, transform_indices = @transform_2, window_bounds = array<i64: 1, 128>}, {pipeline_mode = #tpu.pipeline_mode<synchronous>, transform_indices = @transform_3, window_bounds = array<i64: 1, 128>}, {transform_indices = @transform_4, window_bounds = array<i64: 2, 128>}, {transform_indices = @transform_5, window_bounds = array<i64: 2, 128>}]} {
    %c0 = arith.constant 0 : index
    %c0_0 = arith.constant 0 : index
    %0 = vector.load %arg1[%c0, %c0_0] : memref<2x128xbf16, #tpu.memory_space<vmem>>, vector<2x128xbf16>
    %c0_1 = arith.constant 0 : index
    %c0_2 = arith.constant 0 : index
    %1 = vector.load %arg2[%c0_1, %c0_2] : memref<128x128xbf16, #tpu.memory_space<vmem>>, vector<128x128xbf16>
    %cst = arith.constant dense<0.000000e+00> : vector<2x128xf32>
    %2 = tpu.matmul %0, %1, %cst {dimension_numbers = #tpu.dot_dimension_numbers<[1], [0], [0], [1], [0, 0, 1, 1], [], []>} : vector<2x128xbf16>, vector<128x128xbf16>, vector<2x128xf32> -> vector<2x128xf32>
    %c0_3 = arith.constant 0 : index
    %c0_4 = arith.constant 0 : index
    %3 = vector.load %arg3[%c0_3, %c0_4] : memref<1x128xf32, #tpu.memory_space<vmem>>, vector<1x128xf32>
    %4 = vector.broadcast %3 : vector<1x128xf32> to vector<2x128xf32>
    %5 = arith.mulf %2, %4 : vector<2x128xf32>
    %c0_5 = arith.constant 0 : index
    %c0_6 = arith.constant 0 : index
    %6 = vector.load %arg4[%c0_5, %c0_6] : memref<1x128xf32, #tpu.memory_space<vmem>>, vector<1x128xf32>
    %7 = vector.broadcast %6 : vector<1x128xf32> to vector<2x128xf32>
    %8 = arith.addf %5, %7 : vector<2x128xf32>
    %c0_7 = arith.constant 0 : index
    %c0_8 = arith.constant 0 : index
    %9 = vector.load %arg5[%c0_7, %c0_8] : memref<2x128xbf16, #tpu.memory_space<vmem>>, vector<2x128xbf16>
    %10 = arith.extf %9 : vector<2x128xbf16> to vector<2x128xf32>
    %11 = arith.addf %8, %10 : vector<2x128xf32>
    %12 = arith.truncf %11 : vector<2x128xf32> to vector<2x128xbf16>
    %c0_9 = arith.constant 0 : index
    %c0_10 = arith.constant 0 : index
    %13 = vector.load %arg6[%c0_9, %c0_10] : memref<2x128xbf16, #tpu.memory_space<vmem>>, vector<2x128xbf16>
    tpu.vector_store %arg6[%c0_9, %c0_10], %12 {strides = array<i32>} : memref<2x128xbf16, #tpu.memory_space<vmem>>, vector<2x128xbf16>,
    return
  }
  func.func @transform_0(%arg0: i32) -> (i32, i32) {
    %c0_i32 = arith.constant 0 : i32
    %c0_i32_0 = arith.constant 0 : i32
    return %arg0, %c0_i32 : i32, i32
  }
  func.func @transform_1(%arg0: i32) -> (i32, i32) {
    %c0_i32 = arith.constant 0 : i32
    %c0_i32_0 = arith.constant 0 : i32
    %c0_i32_1 = arith.constant 0 : i32
    return %c0_i32, %c0_i32_0 : i32, i32
  }
  func.func @transform_2(%arg0: i32) -> (i32, i32) {
    %c0_i32 = arith.constant 0 : i32
    %c0_i32_0 = arith.constant 0 : i32
    %c0_i32_1 = arith.constant 0 : i32
    return %c0_i32, %c0_i32_0 : i32, i32
  }
  func.func @transform_3(%arg0: i32) -> (i32, i32) {
    %c0_i32 = arith.constant 0 : i32
    %c0_i32_0 = arith.constant 0 : i32
    %c0_i32_1 = arith.constant 0 : i32
    return %c0_i32, %c0_i32_0 : i32, i32
  }
  func.func @transform_4(%arg0: i32) -> (i32, i32) {
    %c0_i32 = arith.constant 0 : i32
    %c0_i32_0 = arith.constant 0 : i32
    return %arg0, %c0_i32 : i32, i32
  }
  func.func @transform_5(%arg0: i32) -> (i32, i32) {
    %c0_i32 = arith.constant 0 : i32
    %c0_i32_0 = arith.constant 0 : i32
    return %arg0, %c0_i32 : i32, i32
  }
}

module attributes {stable_mosaic.version = 11 : i64} {
  func.func @_fused_res_kernel(%arg0: i32, %arg1: memref<2x128xbf16, #tpu.memory_space<vmem>>, %arg2: memref<128x128xbf16, #tpu.memory_space<vmem>>, %arg3: memref<1x128xf32, #tpu.memory_space<vmem>>, %arg4: memref<1x128xf32, #tpu.memory_space<vmem>>, %arg5: memref<2x128xbf16, #tpu.memory_space<vmem>>, %arg6: memref<2x128xf32, #tpu.memory_space<vmem>>) attributes {dimension_semantics = [#tpu.dimension_semantics<parallel>], iteration_bounds = array<i64: 1>, scalar_prefetch = 0 : i64, scratch_operands = 0 : i64, tpu.core_type = #tpu.core_type<tc>, window_params = [{transform_indices = @transform_0, window_bounds = array<i64: 2, 128>}, {pipeline_mode = #tpu.pipeline_mode<synchronous>, transform_indices = @transform_1, window_bounds = array<i64: 128, 128>}, {pipeline_mode = #tpu.pipeline_mode<synchronous>, transform_indices = @transform_2, window_bounds = array<i64: 1, 128>}, {pipeline_mode = #tpu.pipeline_mode<synchronous>, transform_indices = @transform_3, window_bounds = array<i64: 1, 128>}, {transform_indices = @transform_4, window_bounds = array<i64: 2, 128>}, {transform_indices = @transform_5, window_bounds = array<i64: 2, 128>}]} {
    %c0 = arith.constant 0 : index
    %c0_0 = arith.constant 0 : index
    %0 = vector.load %arg1[%c0, %c0_0] : memref<2x128xbf16, #tpu.memory_space<vmem>>, vector<2x128xbf16>
    %c0_1 = arith.constant 0 : index
    %c0_2 = arith.constant 0 : index
    %1 = vector.load %arg2[%c0_1, %c0_2] : memref<128x128xbf16, #tpu.memory_space<vmem>>, vector<128x128xbf16>
    %cst = arith.constant dense<0.000000e+00> : vector<2x128xf32>
    %2 = tpu.matmul %0, %1, %cst {dimension_numbers = #tpu.dot_dimension_numbers<[1], [0], [0], [1], [0, 0, 1, 1], [], []>} : vector<2x128xbf16>, vector<128x128xbf16>, vector<2x128xf32> -> vector<2x128xf32>
    %c0_3 = arith.constant 0 : index
    %c0_4 = arith.constant 0 : index
    %3 = vector.load %arg3[%c0_3, %c0_4] : memref<1x128xf32, #tpu.memory_space<vmem>>, vector<1x128xf32>
    %4 = vector.broadcast %3 : vector<1x128xf32> to vector<2x128xf32>
    %5 = arith.mulf %2, %4 : vector<2x128xf32>
    %c0_5 = arith.constant 0 : index
    %c0_6 = arith.constant 0 : index
    %6 = vector.load %arg4[%c0_5, %c0_6] : memref<1x128xf32, #tpu.memory_space<vmem>>, vector<1x128xf32>
    %7 = vector.broadcast %6 : vector<1x128xf32> to vector<2x128xf32>
    %8 = arith.addf %5, %7 : vector<2x128xf32>
    %c0_7 = arith.constant 0 : index
    %c0_8 = arith.constant 0 : index
    %9 = vector.load %arg5[%c0_7, %c0_8] : memref<2x128xbf16, #tpu.memory_space<vmem>>, vector<2x128xbf16>
    %10 = arith.extf %9 : vector<2x128xbf16> to vector<2x128xf32>
    %11 = arith.addf %8, %10 : vector<2x128xf32>
    %c0_9 = arith.constant 0 : index
    %c0_10 = arith.constant 0 : index
    %12 = vector.load %arg6[%c0_9, %c0_10] : memref<2x128xf32, #tpu.memory_space<vmem>>, vector<2x128xf32>
    tpu.vector_store %arg6[%c0_9, %c0_10], %11 {strides = array<i32>} : memref<2x128xf32, #tpu.memory_space<vmem>>, vector<2x128xf32>,
    return
  }
  func.func @transform_0(%arg0: i32) -> (i32, i32) {
    %c0_i32 = arith.constant 0 : i32
    %c0_i32_0 = arith.constant 0 : i32
    return %arg0, %c0_i32 : i32, i32
  }
  func.func @transform_1(%arg0: i32) -> (i32, i32) {
    %c0_i32 = arith.constant 0 : i32
    %c0_i32_0 = arith.constant 0 : i32
    %c0_i32_1 = arith.constant 0 : i32
    return %c0_i32, %c0_i32_0 : i32, i32
  }
  func.func @transform_2(%arg0: i32) -> (i32, i32) {
    %c0_i32 = arith.constant 0 : i32
    %c0_i32_0 = arith.constant 0 : i32
    %c0_i32_1 = arith.constant 0 : i32
    return %c0_i32, %c0_i32_0 : i32, i32
  }
  func.func @transform_3(%arg0: i32) -> (i32, i32) {
    %c0_i32 = arith.constant 0 : i32
    %c0_i32_0 = arith.constant 0 : i32
    %c0_i32_1 = arith.constant 0 : i32
    return %c0_i32, %c0_i32_0 : i32, i32
  }
  func.func @transform_4(%arg0: i32) -> (i32, i32) {
    %c0_i32 = arith.constant 0 : i32
    %c0_i32_0 = arith.constant 0 : i32
    return %arg0, %c0_i32 : i32, i32
  }
  func.func @transform_5(%arg0: i32) -> (i32, i32) {
    %c0_i32 = arith.constant 0 : i32
    %c0_i32_0 = arith.constant 0 : i32
    return %arg0, %c0_i32 : i32, i32
  }
}

</mosaic_0001>

<bundles_post_ra>
// kernel: _lambda_.7
= control target key start
LH: loop header
LB: loop body
LE: loop exit
PB: predicated region body
PF: predicated region fallthrough
CT: control target
= control target key end

     0   :  { %s1261_s1 = inlined_call_operand.vmem [shape: bf16[1024,128], index: 1, kind: input, shape index: {}]   ;;  %s1262_s0 = inlined_call_operand.vmem [shape: bf16[16,1024], index: 0, kind: input, shape index: {}]   ;;  %s1263_s2 = inlined_call_operand.vmem [shape: f32[1,128], index: 2, kind: input, shape index: {}]   ;;  %s1264_s3 = inlined_call_operand.vmem [shape: f32[1,128], index: 3, kind: input, shape index: {}]   ;;  %s1265_s4 = inlined_call_operand.vmem [shape: bf16[16,128], index: 4, kind: output, shape index: {}]  }
   0x1   :  { %v947_v0 = vld [vmem:[%s1261_s1 + $0x78] sm:$0xff]   ;;  %v951_v4 = vld [vmem:[%s1261_s1 + $0x70] sm:$0xff]   ;;  %v955_v8 = vld [vmem:[%s1261_s1 + $0x68] sm:$0xff]  }
   0x2   :  { %v948_v1 = vld [vmem:[%s1261_s1 + $0xf8] sm:$0xff]   ;;  %859 = vmatprep.subr.bf16.mxu0 %v947_v0  ;;  %v952_v5 = vld [vmem:[%s1261_s1 + $0xf0] sm:$0xff]   ;;  %v956_v9 = vld [vmem:[%s1261_s1 + $0xe8] sm:$0xff]  }
   0x3   :  { %v949_v2 = vld [vmem:[%s1261_s1 + $0x38] sm:$0xff]   ;;  %881 = vmatprep.subr.bf16.mxu1 %v948_v1  ;;  %v953_v6 = vld [vmem:[%s1261_s1 + $0x30] sm:$0xff]   ;;  %v957_v10 = vld [vmem:[%s1261_s1 + $0x28] sm:$0xff]  }
   0x4   :  { %v950_v3 = vld [vmem:[%s1261_s1 + $0xb8] sm:$0xff]   ;;  %860 = vmatpush3.bf16.msra.mxu0 %v949_v2  ;;  %v954_v7 = vld [vmem:[%s1261_s1 + $0xb0] sm:$0xff]   ;;  %v958_v11 = vld [vmem:[%s1261_s1 + $0xa8] sm:$0xff]  }
   0x5   :  { %882 = vmatpush3.bf16.msra.mxu1 %v950_v3  ;;  %861 = vmatprep.subr.bf16.mxu0 %v951_v4  ;;  %v959_v12 = vld [vmem:[%s1261_s1 + $0x60] sm:$0xff]   ;;  %v963_v16 = vld [vmem:[%s1261_s1 + $0x58] sm:$0xff]   ;;  %v967_v20 = vld [vmem:[%s1261_s1 + $0x50] sm:$0xff]  }
   0x6   :  { %883 = vmatprep.subr.bf16.mxu1 %v952_v5  ;;  %v960_v13 = vld [vmem:[%s1261_s1 + $0xe0] sm:$0xff]   ;;  %v964_v17 = vld [vmem:[%s1261_s1 + $0xd8] sm:$0xff]   ;;  %v968_v21 = vld [vmem:[%s1261_s1 + $0xd0] sm:$0xff]  }
   0x7   :  { %v961_v14 = vld [vmem:[%s1261_s1 + $0x20] sm:$0xff]   ;;  %v965_v18 = vld [vmem:[%s1261_s1 + $0x18] sm:$0xff]   ;;  %v969_v22 = vld [vmem:[%s1261_s1 + $0x10] sm:$0xff]  }
   0x8   :  { %862 = vmatpush3.bf16.msra.mxu0 %v953_v6  ;;  %v962_v15 = vld [vmem:[%s1261_s1 + $0xa0] sm:$0xff]   ;;  %v966_v19 = vld [vmem:[%s1261_s1 + $0x98] sm:$0xff]   ;;  %v970_v23 = vld [vmem:[%s1261_s1 + $0x90] sm:$0xff]  }
   0x9   :  { %884 = vmatpush3.bf16.msra.mxu1 %v954_v7  ;;  %863 = vmatprep.subr.bf16.mxu0 %v955_v8  ;;  %v971_v24 = vld [vmem:[%s1261_s1 + $0x48] sm:$0xff]   ;;  %v975_v28 = vld [vmem:[%s1261_s1 + $0x40] sm:$0xff]   ;;  %v979_v40 = vld [vmem:[%s1261_s1 + $0x178] sm:$0xff]  }
   0xa   :  { %885 = vmatprep.subr.bf16.mxu1 %v956_v9  ;;  %v972_v25 = vld [vmem:[%s1261_s1 + $0xc8] sm:$0xff]   ;;  %v976_v29 = vld [vmem:[%s1261_s1 + $0xc0] sm:$0xff]   ;;  %v980_v41 = vld [vmem:[%s1261_s1 + $0x1f8] sm:$0xff]  }
   0xb   :  { %v973_v26 = vld [vmem:[%s1261_s1 + $0x8] sm:$0xff]   ;;  %v977_v30 = vld [vmem:[%s1261_s1] sm:$0xff]   ;;  %v981_v42 = vld [vmem:[%s1261_s1 + $0x138] sm:$0xff]  }
   0xc   :  { %864 = vmatpush3.bf16.msra.mxu0 %v957_v10  ;;  %v974_v27 = vld [vmem:[%s1261_s1 + $0x88] sm:$0xff]   ;;  %v978_v31 = vld [vmem:[%s1261_s1 + $0x80] sm:$0xff]   ;;  %v982_v43 = vld [vmem:[%s1261_s1 + $0x1b8] sm:$0xff]  }
   0xd   :  { %886 = vmatpush3.bf16.msra.mxu1 %v958_v11  ;;  %865 = vmatprep.subr.bf16.mxu0 %v959_v12  ;;  %v18_v32 = vld [vmem:[%s1262_s0] sm:$0xff]  ;;  %v19_v34 = vld [vmem:[%s1262_s0 + $0x8] sm:$0xff]  ;;  %v983_v44 = vld [vmem:[%s1261_s1 + $0x170] sm:$0xff]  }
   0xe   :  { %887 = vmatprep.subr.bf16.mxu1 %v960_v13  ;;  %v22_v33 = vld [vmem:[%s1262_s0 + $0x20] sm:$0xff]  ;;  %v23_v37 = vld [vmem:[%s1262_s0 + $0x28] sm:$0xff]  ;;  %v984_v45 = vld [vmem:[%s1261_s1 + $0x1f0] sm:$0xff]  }
   0xf   :  { %v776_v35 = vcombine.low %v18_v32, %v22_v33  ;;  %v777_v36 = vcombine.high %v18_v32, %v22_v33  ;;  %v778_v38 = vcombine.low %v19_v34, %v23_v37  ;;  %v779_v39 = vcombine.high %v19_v34, %v23_v37  ;;  %v985_v46 = vld [vmem:[%s1261_s1 + $0x130] sm:$0xff]   ;;  %v987_v48 = vld [vmem:[%s1261_s1 + $0x168] sm:$0xff]   ;;  %v991_v52 = vld [vmem:[%s1261_s1 + $0x160] sm:$0xff]  }
  0x10   :  { %866 = vmatpush3.bf16.msra.mxu0 %v961_v14  ;;  %v986_v47 = vld [vmem:[%s1261_s1 + $0x1b0] sm:$0xff]   ;;  %v988_v49 = vld [vmem:[%s1261_s1 + $0x1e8] sm:$0xff]   ;;  %v992_v53 = vld [vmem:[%s1261_s1 + $0x1e0] sm:$0xff]  }
  0x11   :  { %888 = vmatpush3.bf16.msra.mxu1 %v962_v15  ;;  %867 = vmatprep.subr.bf16.mxu0 %v963_v16  ;;  %v989_v50 = vld [vmem:[%s1261_s1 + $0x128] sm:$0xff]   ;;  %v993_v54 = vld [vmem:[%s1261_s1 + $0x120] sm:$0xff]   ;;  %v995_v56 = vld [vmem:[%s1261_s1 + $0x158] sm:$0xff]  }
  0x12   :  { %889 = vmatprep.subr.bf16.mxu1 %v964_v17  ;;  %610 = vmatprep.mubr.bf16.mxu0 %v777_v36  ;;  %v990_v51 = vld [vmem:[%s1261_s1 + $0x1a8] sm:$0xff]   ;;  %v994_v55 = vld [vmem:[%s1261_s1 + $0x1a0] sm:$0xff]   ;;  %v996_v57 = vld [vmem:[%s1261_s1 + $0x1d8] sm:$0xff]  }
  0x13   :  { %651 = vmatprep.mubr.bf16.mxu1 %v779_v39  ;;  %v997_v58 = vld [vmem:[%s1261_s1 + $0x118] sm:$0xff]   ;;  %v999_v60 = vld [vmem:[%s1261_s1 + $0x150] sm:$0xff]   ;;  %v1003_v0 = vld [vmem:[%s1261_s1 + $0x148] sm:$0xff]  }
  0x14   :  { %868 = vmatpush3.bf16.msra.mxu0 %v965_v18  ;;  %v998_v59 = vld [vmem:[%s1261_s1 + $0x198] sm:$0xff]   ;;  %v1000_v61 = vld [vmem:[%s1261_s1 + $0x1d0] sm:$0xff]   ;;  %v1004_v1 = vld [vmem:[%s1261_s1 + $0x1c8] sm:$0xff]  }
  0x15   :  { %890 = vmatpush3.bf16.msra.mxu1 %v966_v19  ;;  %869 = vmatprep.subr.bf16.mxu0 %v967_v20  ;;  %v1001_v62 = vld [vmem:[%s1261_s1 + $0x110] sm:$0xff]   ;;  %v1005_v2 = vld [vmem:[%s1261_s1 + $0x108] sm:$0xff]   ;;  %v1007_v4 = vld [vmem:[%s1261_s1 + $0x140] sm:$0xff]  }
  0x16   :  { %891 = vmatprep.subr.bf16.mxu1 %v968_v21  ;;  %v1002_v63 = vld [vmem:[%s1261_s1 + $0x190] sm:$0xff]   ;;  %v1006_v3 = vld [vmem:[%s1261_s1 + $0x188] sm:$0xff]   ;;  %v1008_v5 = vld [vmem:[%s1261_s1 + $0x1c0] sm:$0xff]  }
  0x17   :  { %v1009_v6 = vld [vmem:[%s1261_s1 + $0x100] sm:$0xff]   ;;  %v20_v8 = vld [vmem:[%s1262_s0 + $0x10] sm:$0xff]  ;;  %v21_v12 = vld [vmem:[%s1262_s0 + $0x18] sm:$0xff] }
  0x18   :  { %870 = vmatpush3.bf16.msra.mxu0 %v969_v22  ;;  %v1010_v7 = vld [vmem:[%s1261_s1 + $0x180] sm:$0xff]   ;;  %v24_v9 = vld [vmem:[%s1262_s0 + $0x30] sm:$0xff]  ;;  %v25_v13 = vld [vmem:[%s1262_s0 + $0x38] sm:$0xff] }
  0x19   :  { %892 = vmatpush3.bf16.msra.mxu1 %v970_v23  ;;  %871 = vmatprep.subr.bf16.mxu0 %v971_v24  ;;  %v780_v10 = vcombine.low %v20_v8, %v24_v9  ;;  %v781_v11 = vcombine.high %v20_v8, %v24_v9  ;;  %v782_v14 = vcombine.low %v21_v12, %v25_v13 }
  0x1a   :  { %893 = vmatprep.subr.bf16.mxu1 %v972_v25  ;;  %v783_v15 = vcombine.high %v21_v12, %v25_v13 }
  0x1c   :  { %872 = vmatpush3.bf16.msra.mxu0 %v973_v26 }
  0x1d   :  { %894 = vmatpush3.bf16.msra.mxu1 %v974_v27  ;;  %873 = vmatprep.subr.bf16.mxu0 %v975_v28 }
  0x1e   :  { %895 = vmatprep.subr.bf16.mxu1 %v976_v29 }
  0x20   :  { %874 = vmatpush3.bf16.msra.mxu0 %v977_v30 }
  0x21   :  { %896 = vmatpush3.bf16.msra.mxu1 %v978_v31  ;;  %903 = vmatprep.subr.bf16.mxu0 %v979_v40 }
  0x22   :  { %925 = vmatprep.subr.bf16.mxu1 %v980_v41 }
  0x23   :  { %611 = vmatmul.mubr.bf16.vlgmr.msra.gmra.mxu0 %v776_v35 }
  0x24   :  { %652 = vmatmul.mubr.bf16.vlgmr.msra.gmra.mxu1 %v778_v38  ;;  %904 = vmatpush3.bf16.msra.mxu0 %v981_v42  ;;  %v848_v38 = vld [vmem:[%s1263_s2] ss:$0 sm:$0xff] }
  0x25   :  { %926 = vmatpush3.bf16.msra.mxu1 %v982_v43  ;;  %905 = vmatprep.subr.bf16.mxu0 %v983_v44 }
  0x26   :  { %927 = vmatprep.subr.bf16.mxu1 %v984_v45  ;;  %692 = vmatprep.mubr.bf16.mxu0 %v781_v11 }
  0x27   :  { %733 = vmatprep.mubr.bf16.mxu1 %v783_v15 }
  0x28   :  { %906 = vmatpush3.bf16.msra.mxu0 %v985_v46 }
  0x29   :  { %928 = vmatpush3.bf16.msra.mxu1 %v986_v47  ;;  %907 = vmatprep.subr.bf16.mxu0 %v987_v48  ;;  %v849_v47 = vld [vmem:[%s1264_s3] ss:$0 sm:$0xff] }
  0x2a   :  { %929 = vmatprep.subr.bf16.mxu1 %v988_v49 }
  0x2c   :  { %908 = vmatpush3.bf16.msra.mxu0 %v989_v50 }
  0x2d   :  { %930 = vmatpush3.bf16.msra.mxu1 %v990_v51  ;;  %909 = vmatprep.subr.bf16.mxu0 %v991_v52 }
  0x2e   :  { %931 = vmatprep.subr.bf16.mxu1 %v992_v53 }
  0x30   :  { %910 = vmatpush3.bf16.msra.mxu0 %v993_v54 }
  0x31   :  { %932 = vmatpush3.bf16.msra.mxu1 %v994_v55  ;;  %911 = vmatprep.subr.bf16.mxu0 %v995_v56 }
  0x32   :  { %933 = vmatprep.subr.bf16.mxu1 %v996_v57 }
  0x34   :  { %912 = vmatpush3.bf16.msra.mxu0 %v997_v58 }
  0x35   :  { %934 = vmatpush3.bf16.msra.mxu1 %v998_v59  ;;  %913 = vmatprep.subr.bf16.mxu0 %v999_v60 }
  0x36   :  { %935 = vmatprep.subr.bf16.mxu1 %v1000_v61 }
  0x38   :  { %914 = vmatpush3.bf16.msra.mxu0 %v1001_v62 }
  0x39   :  { %936 = vmatpush3.bf16.msra.mxu1 %v1002_v63  ;;  %915 = vmatprep.subr.bf16.mxu0 %v1003_v0 }
  0x3a   :  { %937 = vmatprep.subr.bf16.mxu1 %v1004_v1 }
  0x3c   :  { %916 = vmatpush3.bf16.msra.mxu0 %v1005_v2 }
  0x3d   :  { %938 = vmatpush3.bf16.msra.mxu1 %v1006_v3  ;;  %917 = vmatprep.subr.bf16.mxu0 %v1007_v4 }
  0x3e   :  { %939 = vmatprep.subr.bf16.mxu1 %v1008_v5 }
  0x40   :  { %918 = vmatpush3.bf16.msra.mxu0 %v1009_v6 }
  0x41   :  { %940 = vmatpush3.bf16.msra.mxu1 %v1010_v7 }
  0x43   :  { %693 = vmatmul.mubr.bf16.vlgmr.msra.gmra.mxu0 %v780_v10 }
  0x44   :  { %734 = vmatmul.mubr.bf16.vlgmr.msra.gmra.mxu1 %v782_v14 }
  0xe3   :  { %v875_v16 = vpop.f32.mrf.mxu0 }
  0xe4   :  { %v897_v17 = vpop.f32.mrf.mxu1 }
  0xe5   :  { %v876_v18 = vpop.f32.mrf.mxu0 }
  0xe6   :  { %v898_v19 = vpop.f32.mrf.mxu1  ;;  %v877_v23 = vadd.f32 %v876_v18, %v875_v16 }
  0xe7   :  { %v878_v20 = vpop.f32.mrf.mxu0  ;;  %v899_v24 = vadd.f32 %v898_v19, %v897_v17 }
  0xe8   :  { %v900_v21 = vpop.f32.mrf.mxu1 }
  0xe9   :  { %v879_v22 = vpop.f32.mrf.mxu0  ;;  %v654_v29 = vadd.f32 %v899_v24, %v877_v23 }
  0xea   :  { %v901_v25 = vpop.f32.mrf.mxu1  ;;  %v880_v30 = vadd.f32 %v879_v22, %v878_v20 }
  0xeb   :  { %v902_v31 = vadd.f32 %v901_v25, %v900_v21 }
  0xed   :  { %v657_v40 = vadd.f32 %v902_v31, %v880_v30 }
 0x103   :  { %v919_v26 = vpop.f32.mrf.mxu0 }
 0x104   :  { %v941_v27 = vpop.f32.mrf.mxu1 }
 0x105   :  { %v920_v28 = vpop.f32.mrf.mxu0 }
 0x106   :  { %v921_v32 = vadd.f32 %v920_v28, %v919_v26  ;;  %v942_v33 = vpop.f32.mrf.mxu1 }
 0x107   :  { %v922_v34 = vpop.f32.mrf.mxu0  ;;  %v943_v36 = vadd.f32 %v942_v33, %v941_v27 }
 0x108   :  { %v695_v35 = vadd.f32 %v921_v32, %v654_v29  ;;  %v944_v37 = vpop.f32.mrf.mxu1 }
 0x109   :  { %v923_v39 = vpop.f32.mrf.mxu0 }
 0x10a   :  { %v736_v41 = vadd.f32 %v943_v36, %v695_v35  ;;  %v924_v42 = vadd.f32 %v923_v39, %v922_v34  ;;  %v945_v43 = vpop.f32.mrf.mxu1 }
 0x10b   :  { %v946_v46 = vadd.f32 %v945_v43, %v944_v37 }
 0x10c   :  { %v749_v44 = vmul.f32 %v848_v38, %v736_v41  ;;  %v698_v45 = vadd.f32 %v924_v42, %v657_v40 }
 0x10e   :  { %v739_v48 = vadd.f32 %v946_v46, %v698_v45  ;;  %v758_v49 = vadd.f32 %v849_v47, %v749_v44 }
 0x110   :  { %v750_v50 = vmul.f32 %v848_v38, %v739_v48  ;;  %v760_v52 = vmax.f32 %v758_v49, 0.0 }
 0x112   :  { %v759_v51 = vadd.f32 %v849_v47, %v750_v50 }
 0x114   :  { %v761_v53 = vmax.f32 %v759_v51, 0.0 }
 0x116   :  { %v857_v54 = vpack.c.bf16 %v761_v53, %v760_v52 }
 0x118   :  { %858 = vst [vmem:[%s1265_s4] sm:$0xff] %v857_v54  }

// kernel: _lambda_.8
= control target key start
LH: loop header
LB: loop body
LE: loop exit
PB: predicated region body
PF: predicated region fallthrough
CT: control target
= control target key end

     0   :  { %s1217_s1 = inlined_call_operand.vmem [shape: bf16[1024,128], index: 1, kind: input, shape index: {}]   ;;  %s1218_s0 = inlined_call_operand.vmem [shape: bf16[8,1024], index: 0, kind: input, shape index: {}]   ;;  %s1219_s2 = inlined_call_operand.vmem [shape: f32[1,128], index: 2, kind: input, shape index: {}]   ;;  %s1220_s3 = inlined_call_operand.vmem [shape: f32[1,128], index: 3, kind: input, shape index: {}]   ;;  %s1221_s4 = inlined_call_operand.vmem [shape: bf16[8,128], index: 4, kind: output, shape index: {}]  }
   0x1   :  { %v907_v0 = vld [vmem:[%s1217_s1 + $0x78] sm:$0xff]   ;;  %v911_v4 = vld [vmem:[%s1217_s1 + $0x70] sm:$0xff]   ;;  %v915_v8 = vld [vmem:[%s1217_s1 + $0x68] sm:$0xff]  }
   0x2   :  { %v908_v1 = vld [vmem:[%s1217_s1 + $0xf8] sm:$0xff]   ;;  %819 = vmatprep.subr.bf16.mxu0 %v907_v0  ;;  %v912_v5 = vld [vmem:[%s1217_s1 + $0xf0] sm:$0xff]   ;;  %v916_v9 = vld [vmem:[%s1217_s1 + $0xe8] sm:$0xff]  }
   0x3   :  { %v909_v2 = vld [vmem:[%s1217_s1 + $0x38] sm:$0xff]   ;;  %841 = vmatprep.subr.bf16.mxu1 %v908_v1  ;;  %v913_v6 = vld [vmem:[%s1217_s1 + $0x30] sm:$0xff]   ;;  %v917_v10 = vld [vmem:[%s1217_s1 + $0x28] sm:$0xff]  }
   0x4   :  { %v910_v3 = vld [vmem:[%s1217_s1 + $0xb8] sm:$0xff]   ;;  %820 = vmatpush3.bf16.msra.mxu0 %v909_v2  ;;  %v914_v7 = vld [vmem:[%s1217_s1 + $0xb0] sm:$0xff]   ;;  %v918_v11 = vld [vmem:[%s1217_s1 + $0xa8] sm:$0xff]  }
   0x5   :  { %842 = vmatpush3.bf16.msra.mxu1 %v910_v3  ;;  %821 = vmatprep.subr.bf16.mxu0 %v911_v4  ;;  %v919_v12 = vld [vmem:[%s1217_s1 + $0x60] sm:$0xff]   ;;  %v923_v16 = vld [vmem:[%s1217_s1 + $0x58] sm:$0xff]   ;;  %v927_v20 = vld [vmem:[%s1217_s1 + $0x50] sm:$0xff]  }
   0x6   :  { %843 = vmatprep.subr.bf16.mxu1 %v912_v5  ;;  %v920_v13 = vld [vmem:[%s1217_s1 + $0xe0] sm:$0xff]   ;;  %v924_v17 = vld [vmem:[%s1217_s1 + $0xd8] sm:$0xff]   ;;  %v928_v21 = vld [vmem:[%s1217_s1 + $0xd0] sm:$0xff]  }
   0x7   :  { %v921_v14 = vld [vmem:[%s1217_s1 + $0x20] sm:$0xff]   ;;  %v925_v18 = vld [vmem:[%s1217_s1 + $0x18] sm:$0xff]   ;;  %v929_v22 = vld [vmem:[%s1217_s1 + $0x10] sm:$0xff]  }
   0x8   :  { %822 = vmatpush3.bf16.msra.mxu0 %v913_v6  ;;  %v922_v15 = vld [vmem:[%s1217_s1 + $0xa0] sm:$0xff]   ;;  %v926_v19 = vld [vmem:[%s1217_s1 + $0x98] sm:$0xff]   ;;  %v930_v23 = vld [vmem:[%s1217_s1 + $0x90] sm:$0xff]  }
   0x9   :  { %844 = vmatpush3.bf16.msra.mxu1 %v914_v7  ;;  %823 = vmatprep.subr.bf16.mxu0 %v915_v8  ;;  %v931_v24 = vld [vmem:[%s1217_s1 + $0x48] sm:$0xff]   ;;  %v935_v28 = vld [vmem:[%s1217_s1 + $0x40] sm:$0xff]   ;;  %v943_v38 = vld [vmem:[%s1217_s1 + $0x178] sm:$0xff]  }
   0xa   :  { %845 = vmatprep.subr.bf16.mxu1 %v916_v9  ;;  %v932_v25 = vld [vmem:[%s1217_s1 + $0xc8] sm:$0xff]   ;;  %v936_v29 = vld [vmem:[%s1217_s1 + $0xc0] sm:$0xff]   ;;  %v944_v39 = vld [vmem:[%s1217_s1 + $0x1f8] sm:$0xff]  }
   0xb   :  { %v933_v26 = vld [vmem:[%s1217_s1 + $0x8] sm:$0xff]   ;;  %v937_v30 = vld [vmem:[%s1217_s1] sm:$0xff]   ;;  %v945_v40 = vld [vmem:[%s1217_s1 + $0x138] sm:$0xff]  }
   0xc   :  { %824 = vmatpush3.bf16.msra.mxu0 %v917_v10  ;;  %v934_v27 = vld [vmem:[%s1217_s1 + $0x88] sm:$0xff]   ;;  %v938_v31 = vld [vmem:[%s1217_s1 + $0x80] sm:$0xff]   ;;  %v946_v41 = vld [vmem:[%s1217_s1 + $0x1b8] sm:$0xff]  }
   0xd   :  { %846 = vmatpush3.bf16.msra.mxu1 %v918_v11  ;;  %825 = vmatprep.subr.bf16.mxu0 %v919_v12  ;;  %v18_v32 = vld [vmem:[%s1218_s0] sm:$0xff]  ;;  %v19_v33 = vld [vmem:[%s1218_s0 + $0x8] sm:$0xff]  ;;  %v947_v42 = vld [vmem:[%s1217_s1 + $0x170] sm:$0xff]  }
   0xe   :  { %847 = vmatprep.subr.bf16.mxu1 %v920_v13  ;;  %v745_v34 = vcombine.low %v18_v32, %v18_v32  ;;  %v746_v35 = vcombine.high %v18_v32, %v18_v32  ;;  %v747_v36 = vcombine.low %v19_v33, %v19_v33  ;;  %v748_v37 = vcombine.high %v19_v33, %v19_v33  ;;  %v948_v43 = vld [vmem:[%s1217_s1 + $0x1f0] sm:$0xff]   ;;  %v951_v46 = vld [vmem:[%s1217_s1 + $0x168] sm:$0xff]   ;;  %v955_v50 = vld [vmem:[%s1217_s1 + $0x160] sm:$0xff]  }
   0xf   :  { %v949_v44 = vld [vmem:[%s1217_s1 + $0x130] sm:$0xff]   ;;  %v952_v47 = vld [vmem:[%s1217_s1 + $0x1e8] sm:$0xff]   ;;  %v956_v51 = vld [vmem:[%s1217_s1 + $0x1e0] sm:$0xff]  }
  0x10   :  { %826 = vmatpush3.bf16.msra.mxu0 %v921_v14  ;;  %594 = vmatprep.mubr.bf16.mxu0 %v746_v35  ;;  %v950_v45 = vld [vmem:[%s1217_s1 + $0x1b0] sm:$0xff]   ;;  %v953_v48 = vld [vmem:[%s1217_s1 + $0x128] sm:$0xff]   ;;  %v957_v52 = vld [vmem:[%s1217_s1 + $0x120] sm:$0xff]  }
  0x11   :  { %848 = vmatpush3.bf16.msra.mxu1 %v922_v15  ;;  %827 = vmatprep.subr.bf16.mxu0 %v923_v16  ;;  %v954_v49 = vld [vmem:[%s1217_s1 + $0x1a8] sm:$0xff]   ;;  %v958_v53 = vld [vmem:[%s1217_s1 + $0x1a0] sm:$0xff]   ;;  %v959_v54 = vld [vmem:[%s1217_s1 + $0x158] sm:$0xff]  }
  0x12   :  { %849 = vmatprep.subr.bf16.mxu1 %v924_v17  ;;  %634 = vmatprep.mubr.bf16.mxu1 %v748_v37  ;;  %v960_v55 = vld [vmem:[%s1217_s1 + $0x1d8] sm:$0xff]   ;;  %v963_v58 = vld [vmem:[%s1217_s1 + $0x150] sm:$0xff]   ;;  %v967_v62 = vld [vmem:[%s1217_s1 + $0x148] sm:$0xff]  }
  0x13   :  { %v961_v56 = vld [vmem:[%s1217_s1 + $0x118] sm:$0xff]   ;;  %v964_v59 = vld [vmem:[%s1217_s1 + $0x1d0] sm:$0xff]   ;;  %v968_v63 = vld [vmem:[%s1217_s1 + $0x1c8] sm:$0xff]  }
  0x14   :  { %828 = vmatpush3.bf16.msra.mxu0 %v925_v18  ;;  %v962_v57 = vld [vmem:[%s1217_s1 + $0x198] sm:$0xff]   ;;  %v965_v60 = vld [vmem:[%s1217_s1 + $0x110] sm:$0xff]   ;;  %v969_v0 = vld [vmem:[%s1217_s1 + $0x108] sm:$0xff]  }
  0x15   :  { %850 = vmatpush3.bf16.msra.mxu1 %v926_v19  ;;  %829 = vmatprep.subr.bf16.mxu0 %v927_v20  ;;  %v966_v61 = vld [vmem:[%s1217_s1 + $0x190] sm:$0xff]   ;;  %v970_v1 = vld [vmem:[%s1217_s1 + $0x188] sm:$0xff]   ;;  %v971_v2 = vld [vmem:[%s1217_s1 + $0x140] sm:$0xff]  }
  0x16   :  { %851 = vmatprep.subr.bf16.mxu1 %v928_v21  ;;  %v972_v3 = vld [vmem:[%s1217_s1 + $0x1c0] sm:$0xff]   ;;  %v20_v6 = vld [vmem:[%s1218_s0 + $0x10] sm:$0xff]  ;;  %v21_v9 = vld [vmem:[%s1218_s0 + $0x18] sm:$0xff] }
  0x17   :  { %v973_v4 = vld [vmem:[%s1217_s1 + $0x100] sm:$0xff]   ;;  %v749_v7 = vcombine.low %v20_v6, %v20_v6  ;;  %v750_v8 = vcombine.high %v20_v6, %v20_v6  ;;  %v751_v10 = vcombine.low %v21_v9, %v21_v9  ;;  %v752_v11 = vcombine.high %v21_v9, %v21_v9 }
  0x18   :  { %830 = vmatpush3.bf16.msra.mxu0 %v929_v22  ;;  %v974_v5 = vld [vmem:[%s1217_s1 + $0x180] sm:$0xff]  }
  0x19   :  { %852 = vmatpush3.bf16.msra.mxu1 %v930_v23  ;;  %831 = vmatprep.subr.bf16.mxu0 %v931_v24  ;;  %v817_v32 = vld [vmem:[%s1219_s2] ss:$0 sm:$0xff] }
  0x1a   :  { %853 = vmatprep.subr.bf16.mxu1 %v932_v25 }
  0x1c   :  { %832 = vmatpush3.bf16.msra.mxu0 %v933_v26 }
  0x1d   :  { %854 = vmatpush3.bf16.msra.mxu1 %v934_v27  ;;  %833 = vmatprep.subr.bf16.mxu0 %v935_v28 }
  0x1e   :  { %855 = vmatprep.subr.bf16.mxu1 %v936_v29 }
  0x20   :  { %834 = vmatpush3.bf16.msra.mxu0 %v937_v30 }
  0x21   :  { %856 = vmatpush3.bf16.msra.mxu1 %v938_v31  ;;  %863 = vmatprep.subr.bf16.mxu0 %v943_v38 }
  0x22   :  { %885 = vmatprep.subr.bf16.mxu1 %v944_v39 }
  0x23   :  { %595 = vmatmul.mubr.bf16.vlgmr.msra.gmra.mxu0 %v745_v34 }
  0x24   :  { %635 = vmatmul.mubr.bf16.vlgmr.msra.gmra.mxu1 %v747_v36  ;;  %864 = vmatpush3.bf16.msra.mxu0 %v945_v40  ;;  %v818_v36 = vld [vmem:[%s1220_s3] ss:$0 sm:$0xff] }
  0x25   :  { %886 = vmatpush3.bf16.msra.mxu1 %v946_v41  ;;  %865 = vmatprep.subr.bf16.mxu0 %v947_v42 }
  0x26   :  { %887 = vmatprep.subr.bf16.mxu1 %v948_v43  ;;  %674 = vmatprep.mubr.bf16.mxu0 %v750_v8 }
  0x27   :  { %714 = vmatprep.mubr.bf16.mxu1 %v752_v11 }
  0x28   :  { %866 = vmatpush3.bf16.msra.mxu0 %v949_v44 }
  0x29   :  { %888 = vmatpush3.bf16.msra.mxu1 %v950_v45  ;;  %867 = vmatprep.subr.bf16.mxu0 %v951_v46 }
  0x2a   :  { %889 = vmatprep.subr.bf16.mxu1 %v952_v47 }
  0x2c   :  { %868 = vmatpush3.bf16.msra.mxu0 %v953_v48 }
  0x2d   :  { %890 = vmatpush3.bf16.msra.mxu1 %v954_v49  ;;  %869 = vmatprep.subr.bf16.mxu0 %v955_v50 }
  0x2e   :  { %891 = vmatprep.subr.bf16.mxu1 %v956_v51 }
  0x30   :  { %870 = vmatpush3.bf16.msra.mxu0 %v957_v52 }
  0x31   :  { %892 = vmatpush3.bf16.msra.mxu1 %v958_v53  ;;  %871 = vmatprep.subr.bf16.mxu0 %v959_v54 }
  0x32   :  { %893 = vmatprep.subr.bf16.mxu1 %v960_v55 }
  0x34   :  { %872 = vmatpush3.bf16.msra.mxu0 %v961_v56 }
  0x35   :  { %894 = vmatpush3.bf16.msra.mxu1 %v962_v57  ;;  %873 = vmatprep.subr.bf16.mxu0 %v963_v58 }
  0x36   :  { %895 = vmatprep.subr.bf16.mxu1 %v964_v59 }
  0x38   :  { %874 = vmatpush3.bf16.msra.mxu0 %v965_v60 }
  0x39   :  { %896 = vmatpush3.bf16.msra.mxu1 %v966_v61  ;;  %875 = vmatprep.subr.bf16.mxu0 %v967_v62 }
  0x3a   :  { %897 = vmatprep.subr.bf16.mxu1 %v968_v63 }
  0x3c   :  { %876 = vmatpush3.bf16.msra.mxu0 %v969_v0 }
  0x3d   :  { %898 = vmatpush3.bf16.msra.mxu1 %v970_v1  ;;  %877 = vmatprep.subr.bf16.mxu0 %v971_v2 }
  0x3e   :  { %899 = vmatprep.subr.bf16.mxu1 %v972_v3 }
  0x40   :  { %878 = vmatpush3.bf16.msra.mxu0 %v973_v4 }
  0x41   :  { %900 = vmatpush3.bf16.msra.mxu1 %v974_v5 }
  0x43   :  { %675 = vmatmul.mubr.bf16.vlgmr.msra.gmra.mxu0 %v749_v7 }
  0x44   :  { %715 = vmatmul.mubr.bf16.vlgmr.msra.gmra.mxu1 %v751_v10 }
  0xe3   :  { %v835_v12 = vpop.f32.mrf.mxu0 }
  0xe4   :  { %v857_v13 = vpop.f32.mrf.mxu1 }
  0xe5   :  { %v836_v14 = vpop.f32.mrf.mxu0 }
  0xe6   :  { %v858_v15 = vpop.f32.mrf.mxu1  ;;  %v837_v20 = vadd.f32 %v836_v14, %v835_v12 }
  0xe7   :  { %v838_v16 = vpop.f32.mrf.mxu0  ;;  %v859_v21 = vadd.f32 %v858_v15, %v857_v13 }
  0xe8   :  { %v860_v17 = vpop.f32.mrf.mxu1 }
  0xe9   :  { %v839_v18 = vpop.f32.mrf.mxu0  ;;  %v637_v26 = vadd.f32 %v859_v21, %v837_v20 }
  0xea   :  { %v861_v19 = vpop.f32.mrf.mxu1 }
 0x103   :  { %v879_v22 = vpop.f32.mrf.mxu0 }
 0x104   :  { %v901_v23 = vpop.f32.mrf.mxu1 }
 0x105   :  { %v880_v24 = vpop.f32.mrf.mxu0 }
 0x106   :  { %v902_v25 = vpop.f32.mrf.mxu1  ;;  %v881_v27 = vadd.f32 %v880_v24, %v879_v22 }
 0x107   :  { %v882_v28 = vpop.f32.mrf.mxu0  ;;  %v903_v31 = vadd.f32 %v902_v25, %v901_v23 }
 0x108   :  { %v904_v29 = vpop.f32.mrf.mxu1  ;;  %v677_v30 = vadd.f32 %v881_v27, %v637_v26 }
 0x109   :  { %v883_v33 = vpop.f32.mrf.mxu0 }
 0x10a   :  { %v905_v34 = vpop.f32.mrf.mxu1  ;;  %v717_v35 = vadd.f32 %v903_v31, %v677_v30 }
 0x10c   :  { %v729_v37 = vmul.f32 %v817_v32, %v717_v35 }
 0x10e   :  { %v737_v38 = vadd.f32 %v818_v36, %v729_v37 }
 0x110   :  { %v738_v39 = vmax.f32 %v737_v38, 0.0 }
 0x112   :  { %v739_v40 = vpack.c.bf16 %v738_v39, %v738_v39 }
 0x114   :  { %740 = vst [vmem:[%s1221_s4] sm:$0xf] %v739_v40 }

// kernel: tile.53
= control target key start
LH: loop header
LB: loop body
LE: loop exit
PB: predicated region body
PF: predicated region fallthrough
CT: control target
= control target key end

     0   :  { %s20_s0 = inlined_call_operand.<no memory space> [shape: f32[], index: 0, kind: input, shape index: {}]   ;;  %s21_s1 = inlined_call_operand.vmem [shape: f32[1,128], index: 1, kind: output, shape index: {}]  }
   0x1   :  { %v2_v0 = vstv %s20_s0 }
   0x2   :  { %3 = vst [vmem:[%s21_s1] sm:$0x1] %v2_v0 }

// kernel: _lambda_.9
= control target key start
LH: loop header
LB: loop body
LE: loop exit
PB: predicated region body
PF: predicated region fallthrough
CT: control target
= control target key end

     0   :  { %v1939_v22 = vmov 1966171168   ;;  %v282_v24 = vlaneseq  ;;  %s2398_s1 = inlined_call_operand.vmem [shape: bf16[2048,128], index: 1, kind: input, shape index: {}]   ;;  %s2399_s0 = inlined_call_operand.vmem [shape: bf16[2,2048], index: 0, kind: input, shape index: {}]   ;;  %s2400_s2 = inlined_call_operand.vmem [shape: f32[1,128], index: 2, kind: input, shape index: {}]   ;;  %s2401_s3 = inlined_call_operand.vmem [shape: f32[1,128], index: 3, kind: input, shape index: {}]   ;;  %s2402_s4 = inlined_call_operand.vmem [shape: bf16[2,128], index: 4, kind: output, shape index: {}]  }
   0x1   :  { %v1809_v0 = vld [vmem:[%s2398_s1 + $0x78] sm:$0xff]   ;;  %v1813_v4 = vld [vmem:[%s2398_s1 + $0x70] sm:$0xff]   ;;  %v1817_v8 = vld [vmem:[%s2398_s1 + $0x68] sm:$0xff]   ;;  %v280_v23 = vunpack.c.l.s4 %v1939_v22 }
   0x2   :  { %v1810_v1 = vld [vmem:[%s2398_s1 + $0xf8] sm:$0xff]   ;;  %1632 = vmatprep.subr.bf16.mxu0 %v1809_v0  ;;  %v1814_v5 = vld [vmem:[%s2398_s1 + $0xf0] sm:$0xff]   ;;  %v1818_v9 = vld [vmem:[%s2398_s1 + $0xe8] sm:$0xff]   ;;  %v283_v30 = vshrl.u32 %v282_v24, 7 }
   0x3   :  { %v1811_v2 = vld [vmem:[%s2398_s1 + $0x38] sm:$0xff]   ;;  %1654 = vmatprep.subr.bf16.mxu1 %v1810_v1  ;;  %v1815_v6 = vld [vmem:[%s2398_s1 + $0x30] sm:$0xff]   ;;  %v1819_v10 = vld [vmem:[%s2398_s1 + $0x28] sm:$0xff]   ;;  %v281_v29 = vunpack.c.0.s8 %v280_v23 }
   0x4   :  { %v1812_v3 = vld [vmem:[%s2398_s1 + $0xb8] sm:$0xff]   ;;  %1633 = vmatpush3.bf16.msra.mxu0 %v1811_v2  ;;  %v1816_v7 = vld [vmem:[%s2398_s1 + $0xb0] sm:$0xff]   ;;  %v1820_v11 = vld [vmem:[%s2398_s1 + $0xa8] sm:$0xff]  }
   0x5   :  { %1655 = vmatpush3.bf16.msra.mxu1 %v1812_v3  ;;  %1634 = vmatprep.subr.bf16.mxu0 %v1813_v4  ;;  %v1821_v12 = vld [vmem:[%s2398_s1 + $0x60] sm:$0xff]   ;;  %v1825_v16 = vld [vmem:[%s2398_s1 + $0x58] sm:$0xff]   ;;  %v1829_v20 = vld [vmem:[%s2398_s1 + $0x50] sm:$0xff]   ;;  %v2055_v35 = vsub.s32 %v281_v29, %v283_v30 }
   0x6   :  { %1656 = vmatprep.subr.bf16.mxu1 %v1814_v5  ;;  %v1822_v13 = vld [vmem:[%s2398_s1 + $0xe0] sm:$0xff]   ;;  %v1826_v17 = vld [vmem:[%s2398_s1 + $0xd8] sm:$0xff]   ;;  %v1830_v21 = vld [vmem:[%s2398_s1 + $0xd0] sm:$0xff]  }
   0x7   :  { %v1823_v14 = vld [vmem:[%s2398_s1 + $0x20] sm:$0xff]   ;;  %v1827_v18 = vld [vmem:[%s2398_s1 + $0x18] sm:$0xff]   ;;  %v1831_v25 = vld [vmem:[%s2398_s1 + $0x10] sm:$0xff]  }
   0x8   :  { %1635 = vmatpush3.bf16.msra.mxu0 %v1815_v6  ;;  %v1824_v15 = vld [vmem:[%s2398_s1 + $0xa0] sm:$0xff]   ;;  %v1828_v19 = vld [vmem:[%s2398_s1 + $0x98] sm:$0xff]   ;;  %v1832_v26 = vld [vmem:[%s2398_s1 + $0x90] sm:$0xff]  }
   0x9   :  { %1657 = vmatpush3.bf16.msra.mxu1 %v1816_v7  ;;  %1636 = vmatprep.subr.bf16.mxu0 %v1817_v8  ;;  %v1833_v27 = vld [vmem:[%s2398_s1 + $0x48] sm:$0xff]   ;;  %v1837_v33 = vld [vmem:[%s2398_s1 + $0x40] sm:$0xff]   ;;  %v1843_v41 = vld [vmem:[%s2398_s1 + $0x178] sm:$0xff]  }
   0xa   :  { %1658 = vmatprep.subr.bf16.mxu1 %v1818_v9  ;;  %v1834_v28 = vld [vmem:[%s2398_s1 + $0xc8] sm:$0xff]   ;;  %v1838_v34 = vld [vmem:[%s2398_s1 + $0xc0] sm:$0xff]   ;;  %v1844_v42 = vld [vmem:[%s2398_s1 + $0x1f8] sm:$0xff]  }
   0xb   :  { %v1835_v31 = vld [vmem:[%s2398_s1 + $0x8] sm:$0xff]   ;;  %v1839_v36 = vld [vmem:[%s2398_s1] sm:$0xff]   ;;  %v1845_v47 = vld [vmem:[%s2398_s1 + $0x138] sm:$0xff]  }
   0xc   :  { %1637 = vmatpush3.bf16.msra.mxu0 %v1819_v10  ;;  %v1836_v32 = vld [vmem:[%s2398_s1 + $0x88] sm:$0xff]   ;;  %v1840_v37 = vld [vmem:[%s2398_s1 + $0x80] sm:$0xff]   ;;  %v1847_v50 = vld [vmem:[%s2398_s1 + $0x170] sm:$0xff]  }
   0xd   :  { %1659 = vmatpush3.bf16.msra.mxu1 %v1820_v11  ;;  %1638 = vmatprep.subr.bf16.mxu0 %v1821_v12  ;;  %v18_v38 = vld [vmem:[%s2399_s0] sm:$0xff]  ;;  %v1846_v52 = vld [vmem:[%s2398_s1 + $0x1b8] sm:$0xff]   ;;  %v1848_v54 = vld [vmem:[%s2398_s1 + $0x1f0] sm:$0xff]  }
   0xe   :  { %1660 = vmatprep.subr.bf16.mxu1 %v1822_v13  ;;  %v278_v39 = vcombine.high %v18_v38, %v18_v38  ;;  %v285_v40 = vrot.slane %v18_v38, %v2055_v35  ;;  %v1849_v55 = vld [vmem:[%s2398_s1 + $0x130] sm:$0xff]   ;;  %v1851_v57 = vld [vmem:[%s2398_s1 + $0x168] sm:$0xff]   ;;  %v1855_v61 = vld [vmem:[%s2398_s1 + $0x160] sm:$0xff]  }
   0xf   :  { %v1850_v58 = vld [vmem:[%s2398_s1 + $0x1b0] sm:$0xff]   ;;  %v1852_v59 = vld [vmem:[%s2398_s1 + $0x1e8] sm:$0xff]   ;;  %v1856_v63 = vld [vmem:[%s2398_s1 + $0x1e0] sm:$0xff]  }
  0x10   :  { %1639 = vmatpush3.bf16.msra.mxu0 %v1823_v14  ;;  %v293_v43 = vcombine.high %v285_v40, %v285_v40  ;;  %v301_v44 = vrot.slane %v285_v40, %v2055_v35  ;;  %v2075_v45 = vrot.slane %v278_v39, %v2055_v35  ;;  %v1853_v60 = vld [vmem:[%s2398_s1 + $0x128] sm:$0xff]   ;;  %v1857_v0 = vld [vmem:[%s2398_s1 + $0x120] sm:$0xff]   ;;  %v1859_v1 = vld [vmem:[%s2398_s1 + $0x158] sm:$0xff]  }
  0x11   :  { %1661 = vmatpush3.bf16.msra.mxu1 %v1824_v15  ;;  %1640 = vmatprep.subr.bf16.mxu0 %v1825_v16  ;;  %v1854_v62 = vld [vmem:[%s2398_s1 + $0x1a8] sm:$0xff]   ;;  %v1858_v2 = vld [vmem:[%s2398_s1 + $0x1a0] sm:$0xff]   ;;  %v1860_v3 = vld [vmem:[%s2398_s1 + $0x1d8] sm:$0xff]  }
  0x12   :  { %1662 = vmatprep.subr.bf16.mxu1 %v1826_v17  ;;  %v315_v46 = vrot.slane %v293_v43, %v2055_v35  ;;  %v294_v48 = vcombine.high %v2075_v45, %v2075_v45  ;;  %v323_v49 = vcombine.high %v301_v44, %v301_v44  ;;  %v1861_v4 = vld [vmem:[%s2398_s1 + $0x118] sm:$0xff]   ;;  %v2135_v5 = vld [vmem:[%s2399_s0 + $0x8] sm:$0xff]  ;;  %v1863_v6 = vld [vmem:[%s2398_s1 + $0x150] sm:$0xff]  }
  0x13   :  { %v1862_v7 = vld [vmem:[%s2398_s1 + $0x198] sm:$0xff]   ;;  %v1864_v8 = vld [vmem:[%s2398_s1 + $0x1d0] sm:$0xff]   ;;  %v1867_v10 = vld [vmem:[%s2398_s1 + $0x148] sm:$0xff]   ;;  %v2157_v12 = vrot.slane %v2135_v5, %v2055_v35 }
  0x14   :  { %1641 = vmatpush3.bf16.msra.mxu0 %v1827_v18  ;;  %1192 = vmatprep.mubr.bf16.mxu0 %v315_v46  ;;  %v325_v51 = vcombine.high %v315_v46, %v315_v46  ;;  %v322_v53 = vrot.slane %v294_v48, %v2055_v35  ;;  %v1865_v9 = vld [vmem:[%s2398_s1 + $0x110] sm:$0xff]   ;;  %v1868_v13 = vld [vmem:[%s2398_s1 + $0x1c8] sm:$0xff]   ;;  %v1871_v15 = vld [vmem:[%s2398_s1 + $0x140] sm:$0xff]   ;;  %v327_v46 = vcombine.high %v2135_v5, %v2135_v5 }
  0x15   :  { %1663 = vmatpush3.bf16.msra.mxu1 %v1828_v19  ;;  %1642 = vmatprep.subr.bf16.mxu0 %v1829_v20  ;;  %v1866_v11 = vld [vmem:[%s2398_s1 + $0x190] sm:$0xff]   ;;  %v1869_v14 = vld [vmem:[%s2398_s1 + $0x108] sm:$0xff]   ;;  %v342_v17 = vcombine.high %v2157_v12, %v2157_v12  ;;  %v1872_v18 = vld [vmem:[%s2398_s1 + $0x1c0] sm:$0xff]   ;;  %v308_v20 = vrot.slane %v2075_v45, %v2055_v35 }
  0x16   :  { %1664 = vmatprep.subr.bf16.mxu1 %v1830_v21  ;;  %1232 = vmatprep.mubr.bf16.mxu1 %v325_v51  ;;  %v326_v56 = vcombine.high %v322_v53, %v322_v53  ;;  %v1870_v16 = vld [vmem:[%s2398_s1 + $0x188] sm:$0xff]   ;;  %v1873_v19 = vld [vmem:[%s2398_s1 + $0x100] sm:$0xff]   ;;  %v1875_v21 = vld [vmem:[%s2398_s1 + $0x278] sm:$0xff]  }
  0x17   :  { %v1874_v22 = vld [vmem:[%s2398_s1 + $0x180] sm:$0xff]   ;;  %v364_v23 = vrot.slane %v342_v17, %v2055_v35  ;;  %v1876_v24 = vld [vmem:[%s2398_s1 + $0x2f8] sm:$0xff]   ;;  %v1880_v30 = vld [vmem:[%s2398_s1 + $0x2f0] sm:$0xff]  }
  0x18   :  { %1643 = vmatpush3.bf16.msra.mxu0 %v1831_v25  ;;  %v1877_v25 = vld [vmem:[%s2398_s1 + $0x238] sm:$0xff]   ;;  %v1886_v38 = vld [vmem:[%s2398_s1 + $0x2a8] sm:$0xff]   ;;  %v1888_v39 = vld [vmem:[%s2398_s1 + $0x2e0] sm:$0xff]  }
  0x19   :  { %1665 = vmatpush3.bf16.msra.mxu1 %v1832_v26  ;;  %1644 = vmatprep.subr.bf16.mxu0 %v1833_v27  ;;  %v324_v26 = vcombine.high %v308_v20, %v308_v20  ;;  %v1879_v27 = vld [vmem:[%s2398_s1 + $0x270] sm:$0xff]   ;;  %v374_v29 = vcombine.high %v364_v23, %v364_v23  ;;  %v1889_v40 = vld [vmem:[%s2398_s1 + $0x220] sm:$0xff]   ;;  %v1892_v43 = vld [vmem:[%s2398_s1 + $0x2d8] sm:$0xff]  }
  0x1a   :  { %1666 = vmatprep.subr.bf16.mxu1 %v1834_v28  ;;  %v1878_v28 = vld [vmem:[%s2398_s1 + $0x2b8] sm:$0xff]   ;;  %v1895_v45 = vld [vmem:[%s2398_s1 + $0x250] sm:$0xff]   ;;  %v1922_v17 = vld [vmem:[%s2398_s1 + $0x3a0] sm:$0xff]  }
  0x1b   :  { %v1896_v48 = vld [vmem:[%s2398_s1 + $0x2d0] sm:$0xff]  }
  0x1c   :  { %1645 = vmatpush3.bf16.msra.mxu0 %v1835_v31  ;;  %v1881_v31 = vld [vmem:[%s2398_s1 + $0x230] sm:$0xff]  }
  0x1d   :  { %1667 = vmatpush3.bf16.msra.mxu1 %v1836_v32  ;;  %1646 = vmatprep.subr.bf16.mxu0 %v1837_v33  ;;  %v1883_v32 = vld [vmem:[%s2398_s1 + $0x268] sm:$0xff]   ;;  %v1882_v33 = vld [vmem:[%s2398_s1 + $0x2b0] sm:$0xff]  }
  0x1e   :  { %1668 = vmatprep.subr.bf16.mxu1 %v1838_v34  ;;  %v1884_v34 = vld [vmem:[%s2398_s1 + $0x2e8] sm:$0xff]   ;;  %v1898_v51 = vld [vmem:[%s2398_s1 + $0x290] sm:$0xff]  }
  0x20   :  { %1647 = vmatpush3.bf16.msra.mxu0 %v1839_v36  ;;  %v1885_v36 = vld [vmem:[%s2398_s1 + $0x228] sm:$0xff]  }
  0x21   :  { %1669 = vmatpush3.bf16.msra.mxu1 %v1840_v37  ;;  %1676 = vmatprep.subr.bf16.mxu0 %v1843_v41  ;;  %v1887_v37 = vld [vmem:[%s2398_s1 + $0x260] sm:$0xff]   ;;  %v1891_v41 = vld [vmem:[%s2398_s1 + $0x258] sm:$0xff]  }
  0x22   :  { %1698 = vmatprep.subr.bf16.mxu1 %v1844_v42  ;;  %v1890_v42 = vld [vmem:[%s2398_s1 + $0x2a0] sm:$0xff]  }
  0x23   :  { %1193 = vmatmul.mubr.bf16.vlgmr.msra.gmra.mxu0 %v301_v44  ;;  %v1893_v44 = vld [vmem:[%s2398_s1 + $0x218] sm:$0xff]  }
  0x24   :  { %1677 = vmatpush3.bf16.msra.mxu0 %v1845_v47  ;;  %1233 = vmatmul.mubr.bf16.vlgmr.msra.gmra.mxu1 %v323_v49  ;;  %v1894_v47 = vld [vmem:[%s2398_s1 + $0x298] sm:$0xff]   ;;  %v1897_v49 = vld [vmem:[%s2398_s1 + $0x210] sm:$0xff]  }
  0x25   :  { %1678 = vmatprep.subr.bf16.mxu0 %v1847_v50  ;;  %1699 = vmatpush3.bf16.msra.mxu1 %v1846_v52  ;;  %v1899_v50 = vld [vmem:[%s2398_s1 + $0x248] sm:$0xff]   ;;  %v2263_v52 = vrot.slane %v327_v46, %v2055_v35 }
  0x26   :  { %1272 = vmatprep.mubr.bf16.mxu0 %v322_v53  ;;  %1700 = vmatprep.subr.bf16.mxu1 %v1848_v54  ;;  %v1900_v53 = vld [vmem:[%s2398_s1 + $0x2c8] sm:$0xff]  }
  0x27   :  { %1312 = vmatprep.mubr.bf16.mxu1 %v326_v56  ;;  %v1901_v54 = vld [vmem:[%s2398_s1 + $0x208] sm:$0xff]  }
  0x28   :  { %1679 = vmatpush3.bf16.msra.mxu0 %v1849_v55  ;;  %v1903_v55 = vld [vmem:[%s2398_s1 + $0x240] sm:$0xff]   ;;  %v1902_v56 = vld [vmem:[%s2398_s1 + $0x288] sm:$0xff]  }
  0x29   :  { %1680 = vmatprep.subr.bf16.mxu0 %v1851_v57  ;;  %1701 = vmatpush3.bf16.msra.mxu1 %v1850_v58  ;;  %v343_v57 = vcombine.high %v2263_v52, %v2263_v52  ;;  %v1904_v58 = vld [vmem:[%s2398_s1 + $0x2c0] sm:$0xff]  }
  0x2a   :  { %1702 = vmatprep.subr.bf16.mxu1 %v1852_v59  ;;  %v1905_v59 = vld [vmem:[%s2398_s1 + $0x200] sm:$0xff]  }
  0x2c   :  { %1681 = vmatpush3.bf16.msra.mxu0 %v1853_v60  ;;  %v350_v60 = vrot.slane %v2157_v12, %v2055_v35  ;;  %v1919_v12 = vld [vmem:[%s2398_s1 + $0x360] sm:$0xff]  }
  0x2d   :  { %1682 = vmatprep.subr.bf16.mxu0 %v1855_v61  ;;  %1703 = vmatpush3.bf16.msra.mxu1 %v1854_v62  ;;  %v1907_v61 = vld [vmem:[%s2398_s1 + $0x378] sm:$0xff]   ;;  %v1906_v62 = vld [vmem:[%s2398_s1 + $0x280] sm:$0xff]  }
  0x2e   :  { %1704 = vmatprep.subr.bf16.mxu1 %v1856_v63  ;;  %v371_v63 = vrot.slane %v343_v57, %v2055_v35 }
  0x30   :  { %1683 = vmatpush3.bf16.msra.mxu0 %v1857_v0  ;;  %v1908_v0 = vld [vmem:[%s2398_s1 + $0x3f8] sm:$0xff]   ;;  %v375_v5 = vcombine.high %v371_v63, %v371_v63 }
  0x31   :  { %1684 = vmatprep.subr.bf16.mxu0 %v1859_v1  ;;  %1705 = vmatpush3.bf16.msra.mxu1 %v1858_v2  ;;  %v1909_v1 = vld [vmem:[%s2398_s1 + $0x338] sm:$0xff]   ;;  %v372_v2 = vcombine.high %v350_v60, %v350_v60 }
  0x32   :  { %1706 = vmatprep.subr.bf16.mxu1 %v1860_v3  ;;  %v1911_v3 = vld [vmem:[%s2398_s1 + $0x370] sm:$0xff]  }
  0x34   :  { %1685 = vmatpush3.bf16.msra.mxu0 %v1861_v4  ;;  %v1910_v4 = vld [vmem:[%s2398_s1 + $0x3b8] sm:$0xff]  }
  0x35   :  { %1686 = vmatprep.subr.bf16.mxu0 %v1863_v6  ;;  %1707 = vmatpush3.bf16.msra.mxu1 %v1862_v7  ;;  %v1912_v6 = vld [vmem:[%s2398_s1 + $0x3f0] sm:$0xff]  }
  0x36   :  { %1708 = vmatprep.subr.bf16.mxu1 %v1864_v8  ;;  %v1913_v7 = vld [vmem:[%s2398_s1 + $0x330] sm:$0xff]   ;;  %v1915_v8 = vld [vmem:[%s2398_s1 + $0x368] sm:$0xff]  }
  0x38   :  { %1687 = vmatpush3.bf16.msra.mxu0 %v1865_v9  ;;  %v1914_v9 = vld [vmem:[%s2398_s1 + $0x3b0] sm:$0xff]  }
  0x39   :  { %1688 = vmatprep.subr.bf16.mxu0 %v1867_v10  ;;  %1709 = vmatpush3.bf16.msra.mxu1 %v1866_v11  ;;  %v1916_v10 = vld [vmem:[%s2398_s1 + $0x3e8] sm:$0xff]  }
  0x3a   :  { %1710 = vmatprep.subr.bf16.mxu1 %v1868_v13  ;;  %v1917_v11 = vld [vmem:[%s2398_s1 + $0x328] sm:$0xff]  }
  0x3b   :  { %v1918_v13 = vld [vmem:[%s2398_s1 + $0x3a8] sm:$0xff]  }
  0x3c   :  { %1689 = vmatpush3.bf16.msra.mxu0 %v1869_v14  ;;  %v1920_v14 = vld [vmem:[%s2398_s1 + $0x3e0] sm:$0xff]  }
  0x3d   :  { %1690 = vmatprep.subr.bf16.mxu0 %v1871_v15  ;;  %1711 = vmatpush3.bf16.msra.mxu1 %v1870_v16  ;;  %v1921_v15 = vld [vmem:[%s2398_s1 + $0x320] sm:$0xff]   ;;  %v1923_v16 = vld [vmem:[%s2398_s1 + $0x358] sm:$0xff]  }
  0x3e   :  { %1712 = vmatprep.subr.bf16.mxu1 %v1872_v18  ;;  %v1924_v18 = vld [vmem:[%s2398_s1 + $0x3d8] sm:$0xff]  }
  0x40   :  { %1691 = vmatpush3.bf16.msra.mxu0 %v1873_v19  ;;  %v1925_v19 = vld [vmem:[%s2398_s1 + $0x318] sm:$0xff]  }
  0x41   :  { %1720 = vmatprep.subr.bf16.mxu0 %v1875_v21  ;;  %1713 = vmatpush3.bf16.msra.mxu1 %v1874_v22  ;;  %v1926_v21 = vld [vmem:[%s2398_s1 + $0x398] sm:$0xff]   ;;  %v1928_v22 = vld [vmem:[%s2398_s1 + $0x3d0] sm:$0xff]  }
  0x42   :  { %1742 = vmatprep.subr.bf16.mxu1 %v1876_v24  ;;  %v1931_v24 = vld [vmem:[%s2398_s1 + $0x348] sm:$0xff]  }
  0x43   :  { %1273 = vmatmul.mubr.bf16.vlgmr.msra.gmra.mxu0 %v308_v20  ;;  %v1927_v20 = vld [vmem:[%s2398_s1 + $0x350] sm:$0xff]  }
  0x44   :  { %1721 = vmatpush3.bf16.msra.mxu0 %v1877_v25  ;;  %1352 = vmatprep.mubr.bf16.mxu0 %v364_v23  ;;  %v1929_v23 = vld [vmem:[%s2398_s1 + $0x310] sm:$0xff]  }
  0x45   :  { %1313 = vmatmul.mubr.bf16.vlgmr.msra.gmra.mxu1 %v324_v26  ;;  %1722 = vmatprep.subr.bf16.mxu0 %v1879_v27  ;;  %v1930_v25 = vld [vmem:[%s2398_s1 + $0x390] sm:$0xff]   ;;  %v1932_v26 = vld [vmem:[%s2398_s1 + $0x3c8] sm:$0xff]  }
  0x46   :  { %1743 = vmatpush3.bf16.msra.mxu1 %v1878_v28  ;;  %1392 = vmatprep.mubr.bf16.mxu1 %v374_v29  ;;  %v1933_v27 = vld [vmem:[%s2398_s1 + $0x308] sm:$0xff]   ;;  %v1935_v28 = vld [vmem:[%s2398_s1 + $0x340] sm:$0xff]  }
  0x47   :  { %1744 = vmatprep.subr.bf16.mxu1 %v1880_v30  ;;  %v1934_v29 = vld [vmem:[%s2398_s1 + $0x388] sm:$0xff]   ;;  %v1936_v30 = vld [vmem:[%s2398_s1 + $0x3c0] sm:$0xff]  }
  0x48   :  { %1723 = vmatpush3.bf16.msra.mxu0 %v1881_v31  ;;  %v1937_v31 = vld [vmem:[%s2398_s1 + $0x300] sm:$0xff]  }
  0x49   :  { %1724 = vmatprep.subr.bf16.mxu0 %v1883_v32  ;;  %v357_v32 = vrot.slane %v2263_v52, %v2055_v35 }
  0x4a   :  { %1745 = vmatpush3.bf16.msra.mxu1 %v1882_v33  ;;  %v1938_v33 = vld [vmem:[%s2398_s1 + $0x380] sm:$0xff]  }
  0x4b   :  { %1746 = vmatprep.subr.bf16.mxu1 %v1884_v34  ;;  %v373_v34 = vcombine.high %v357_v32, %v357_v32 }
  0x4c   :  { %1725 = vmatpush3.bf16.msra.mxu0 %v1885_v36 }
  0x4d   :  { %1726 = vmatprep.subr.bf16.mxu0 %v1887_v37 }
  0x4e   :  { %1747 = vmatpush3.bf16.msra.mxu1 %v1886_v38 }
  0x4f   :  { %1748 = vmatprep.subr.bf16.mxu1 %v1888_v39 }
  0x50   :  { %1727 = vmatpush3.bf16.msra.mxu0 %v1889_v40 }
  0x51   :  { %1728 = vmatprep.subr.bf16.mxu0 %v1891_v41 }
  0x52   :  { %1749 = vmatpush3.bf16.msra.mxu1 %v1890_v42 }
  0x53   :  { %1750 = vmatprep.subr.bf16.mxu1 %v1892_v43 }
  0x54   :  { %1729 = vmatpush3.bf16.msra.mxu0 %v1893_v44 }
  0x55   :  { %1730 = vmatprep.subr.bf16.mxu0 %v1895_v45 }
  0x56   :  { %1751 = vmatpush3.bf16.msra.mxu1 %v1894_v47 }
  0x57   :  { %1752 = vmatprep.subr.bf16.mxu1 %v1896_v48 }
  0x58   :  { %1731 = vmatpush3.bf16.msra.mxu0 %v1897_v49 }
  0x59   :  { %1732 = vmatprep.subr.bf16.mxu0 %v1899_v50 }
  0x5a   :  { %1753 = vmatpush3.bf16.msra.mxu1 %v1898_v51 }
  0x5b   :  { %1754 = vmatprep.subr.bf16.mxu1 %v1900_v53 }
  0x5c   :  { %1733 = vmatpush3.bf16.msra.mxu0 %v1901_v54 }
  0x5d   :  { %1734 = vmatprep.subr.bf16.mxu0 %v1903_v55 }
  0x5e   :  { %1755 = vmatpush3.bf16.msra.mxu1 %v1902_v56 }
  0x5f   :  { %1756 = vmatprep.subr.bf16.mxu1 %v1904_v58 }
  0x60   :  { %1735 = vmatpush3.bf16.msra.mxu0 %v1905_v59 }
  0x61   :  { %1764 = vmatprep.subr.bf16.mxu0 %v1907_v61 }
  0x62   :  { %1757 = vmatpush3.bf16.msra.mxu1 %v1906_v62 }
  0x63   :  { %1353 = vmatmul.mubr.bf16.vlgmr.msra.gmra.mxu0 %v350_v60  ;;  %1786 = vmatprep.subr.bf16.mxu1 %v1908_v0 }
  0x64   :  { %1765 = vmatpush3.bf16.msra.mxu0 %v1909_v1  ;;  %1432 = vmatprep.mubr.bf16.mxu0 %v371_v63 }
  0x65   :  { %1393 = vmatmul.mubr.bf16.vlgmr.msra.gmra.mxu1 %v372_v2  ;;  %1766 = vmatprep.subr.bf16.mxu0 %v1911_v3 }
  0x66   :  { %1787 = vmatpush3.bf16.msra.mxu1 %v1910_v4  ;;  %1472 = vmatprep.mubr.bf16.mxu1 %v375_v5 }
  0x67   :  { %1788 = vmatprep.subr.bf16.mxu1 %v1912_v6 }
  0x68   :  { %1767 = vmatpush3.bf16.msra.mxu0 %v1913_v7 }
  0x69   :  { %1768 = vmatprep.subr.bf16.mxu0 %v1915_v8 }
  0x6a   :  { %1789 = vmatpush3.bf16.msra.mxu1 %v1914_v9 }
  0x6b   :  { %1790 = vmatprep.subr.bf16.mxu1 %v1916_v10 }
  0x6c   :  { %1769 = vmatpush3.bf16.msra.mxu0 %v1917_v11 }
  0x6d   :  { %1770 = vmatprep.subr.bf16.mxu0 %v1919_v12 }
  0x6e   :  { %1791 = vmatpush3.bf16.msra.mxu1 %v1918_v13 }
  0x6f   :  { %1792 = vmatprep.subr.bf16.mxu1 %v1920_v14  ;;  %v1630_v14 = vld [vmem:[%s2400_s2] ss:$0 sm:$0xff] }
  0x70   :  { %1771 = vmatpush3.bf16.msra.mxu0 %v1921_v15 }
  0x71   :  { %1772 = vmatprep.subr.bf16.mxu0 %v1923_v16 }
  0x72   :  { %1793 = vmatpush3.bf16.msra.mxu1 %v1922_v17 }
  0x73   :  { %1794 = vmatprep.subr.bf16.mxu1 %v1924_v18  ;;  %v1631_v18 = vld [vmem:[%s2401_s3] ss:$0 sm:$0xff] }
  0x74   :  { %1773 = vmatpush3.bf16.msra.mxu0 %v1925_v19 }
  0x75   :  { %1774 = vmatprep.subr.bf16.mxu0 %v1927_v20 }
  0x76   :  { %1795 = vmatpush3.bf16.msra.mxu1 %v1926_v21 }
  0x77   :  { %1796 = vmatprep.subr.bf16.mxu1 %v1928_v22 }
  0x78   :  { %1775 = vmatpush3.bf16.msra.mxu0 %v1929_v23 }
  0x79   :  { %1776 = vmatprep.subr.bf16.mxu0 %v1931_v24 }
  0x7a   :  { %1797 = vmatpush3.bf16.msra.mxu1 %v1930_v25 }
  0x7b   :  { %1798 = vmatprep.subr.bf16.mxu1 %v1932_v26 }
  0x7c   :  { %1777 = vmatpush3.bf16.msra.mxu0 %v1933_v27 }
  0x7d   :  { %1778 = vmatprep.subr.bf16.mxu0 %v1935_v28 }
  0x7e   :  { %1799 = vmatpush3.bf16.msra.mxu1 %v1934_v29 }
  0x7f   :  { %1800 = vmatprep.subr.bf16.mxu1 %v1936_v30 }
  0x80   :  { %1779 = vmatpush3.bf16.msra.mxu0 %v1937_v31 }
  0x82   :  { %1801 = vmatpush3.bf16.msra.mxu1 %v1938_v33 }
  0x83   :  { %1433 = vmatmul.mubr.bf16.vlgmr.msra.gmra.mxu0 %v357_v32 }
  0x85   :  { %1473 = vmatmul.mubr.bf16.vlgmr.msra.gmra.mxu1 %v373_v34 }
  0xe3   :  { %v1648_v36 = vpop.f32.mrf.mxu0 }
  0xe4   :  { %v1670_v37 = vpop.f32.mrf.mxu1 }
  0xe5   :  { %v1649_v38 = vpop.f32.mrf.mxu0 }
  0xe6   :  { %v1650_v39 = vadd.f32 %v1649_v38, %v1648_v36  ;;  %v1671_v40 = vpop.f32.mrf.mxu1 }
  0xe7   :  { %v1651_v41 = vpop.f32.mrf.mxu0  ;;  %v1672_v42 = vadd.f32 %v1671_v40, %v1670_v37 }
  0xe8   :  { %v1673_v43 = vpop.f32.mrf.mxu1 }
  0xe9   :  { %v1652_v35 = vpop.f32.mrf.mxu0  ;;  %v1235_v44 = vadd.f32 %v1672_v42, %v1650_v39 }
  0xea   :  { %v1674_v45 = vpop.f32.mrf.mxu1 }
 0x103   :  { %v1692_v46 = vpop.f32.mrf.mxu0 }
 0x105   :  { %v1714_v47 = vpop.f32.mrf.mxu1  ;;  %v1693_v48 = vpop.f32.mrf.mxu0 }
 0x106   :  { %v1694_v62 = vadd.f32 %v1693_v48, %v1692_v46 }
 0x107   :  { %v1715_v49 = vpop.f32.mrf.mxu1  ;;  %v1695_v50 = vpop.f32.mrf.mxu0 }
 0x108   :  { %v1275_v63 = vadd.f32 %v1694_v62, %v1235_v44  ;;  %v1716_v0 = vadd.f32 %v1715_v49, %v1714_v47 }
 0x109   :  { %v1717_v51 = vpop.f32.mrf.mxu1  ;;  %v1696_v52 = vpop.f32.mrf.mxu0 }
 0x10a   :  { %v1315_v2 = vadd.f32 %v1716_v0, %v1275_v63 }
 0x10b   :  { %v1718_v53 = vpop.f32.mrf.mxu1 }
 0x123   :  { %v1736_v54 = vpop.f32.mrf.mxu0 }
 0x125   :  { %v1758_v55 = vpop.f32.mrf.mxu1  ;;  %v1737_v56 = vpop.f32.mrf.mxu0 }
 0x126   :  { %v1738_v1 = vadd.f32 %v1737_v56, %v1736_v54 }
 0x127   :  { %v1759_v57 = vpop.f32.mrf.mxu1  ;;  %v1739_v58 = vpop.f32.mrf.mxu0 }
 0x128   :  { %v1355_v3 = vadd.f32 %v1738_v1, %v1315_v2  ;;  %v1760_v4 = vadd.f32 %v1759_v57, %v1758_v55 }
 0x129   :  { %v1761_v59 = vpop.f32.mrf.mxu1  ;;  %v1740_v60 = vpop.f32.mrf.mxu0 }
 0x12a   :  { %v1395_v8 = vadd.f32 %v1760_v4, %v1355_v3 }
 0x12b   :  { %v1762_v61 = vpop.f32.mrf.mxu1 }
 0x143   :  { %v1780_v5 = vpop.f32.mrf.mxu0 }
 0x145   :  { %v1802_v6 = vpop.f32.mrf.mxu1  ;;  %v1781_v7 = vpop.f32.mrf.mxu0 }
 0x146   :  { %v1782_v9 = vadd.f32 %v1781_v7, %v1780_v5 }
 0x147   :  { %v1803_v10 = vpop.f32.mrf.mxu1  ;;  %v1783_v11 = vpop.f32.mrf.mxu0 }
 0x148   :  { %v1435_v12 = vadd.f32 %v1782_v9, %v1395_v8  ;;  %v1804_v13 = vadd.f32 %v1803_v10, %v1802_v6 }
 0x149   :  { %v1805_v15 = vpop.f32.mrf.mxu1  ;;  %v1784_v16 = vpop.f32.mrf.mxu0 }
 0x14a   :  { %v1475_v17 = vadd.f32 %v1804_v13, %v1435_v12 }
 0x14b   :  { %v1806_v19 = vpop.f32.mrf.mxu1 }
 0x14c   :  { %v1487_v20 = vmul.f32 %v1630_v14, %v1475_v17 }
 0x14e   :  { %v1495_v21 = vadd.f32 %v1631_v18, %v1487_v20 }
 0x150   :  { %v1496_v22 = vpack.c.bf16 %v1495_v21, %v1495_v21 }
 0x152   :  { %1497 = vst [vmem:[%s2402_s4] sm:$0x1] %v1496_v22 }

// kernel: _lambda_.10
= control target key start
LH: loop header
LB: loop body
LE: loop exit
PB: predicated region body
PF: predicated region fallthrough
CT: control target
= control target key end

     0   :  { %v1162_v24 = vmov 1966171168   ;;  %v172_v26 = vlaneseq  ;;  %v1163_v40 = vmov 0   ;;  %vm1165_vm0 = vmmov 0   ;;  %s1440_s1 = inlined_call_operand.vmem [shape: bf16[1152,128], index: 1, kind: input, shape index: {}]   ;;  %s1441_s0 = inlined_call_operand.vmem [shape: bf16[2,1152], index: 0, kind: input, shape index: {}]   ;;  %s1442_s2 = inlined_call_operand.vmem [shape: f32[1,128], index: 2, kind: input, shape index: {}]   ;;  %s1443_s3 = inlined_call_operand.vmem [shape: f32[1,128], index: 3, kind: input, shape index: {}]   ;;  %s1444_s4 = inlined_call_operand.vmem [shape: bf16[2,128], index: 4, kind: output, shape index: {}]  }
   0x1   :  { %v1090_v0 = vld [vmem:[%s1440_s1 + $0x78] sm:$0xff]   ;;  %v1094_v4 = vld [vmem:[%s1440_s1 + $0x70] sm:$0xff]   ;;  %v1098_v8 = vld [vmem:[%s1440_s1 + $0x68] sm:$0xff]   ;;  %v170_v25 = vunpack.c.l.s4 %v1162_v24 }
   0x2   :  { %v1091_v1 = vld [vmem:[%s1440_s1 + $0xf8] sm:$0xff]   ;;  %969 = vmatprep.subr.bf16.mxu0 %v1090_v0  ;;  %v1095_v5 = vld [vmem:[%s1440_s1 + $0xf0] sm:$0xff]   ;;  %v1099_v9 = vld [vmem:[%s1440_s1 + $0xe8] sm:$0xff]   ;;  %v173_v32 = vshrl.u32 %v172_v26, 7  ;;  %v1164_v26 = vmov 0.0  }
   0x3   :  { %v1092_v2 = vld [vmem:[%s1440_s1 + $0x38] sm:$0xff]   ;;  %991 = vmatprep.subr.bf16.mxu1 %v1091_v1  ;;  %v1096_v6 = vld [vmem:[%s1440_s1 + $0x30] sm:$0xff]   ;;  %v1100_v10 = vld [vmem:[%s1440_s1 + $0x28] sm:$0xff]   ;;  %v171_v31 = vunpack.c.0.s8 %v170_v25 }
   0x4   :  { %v1093_v3 = vld [vmem:[%s1440_s1 + $0xb8] sm:$0xff]   ;;  %970 = vmatpush3.bf16.msra.mxu0 %v1092_v2  ;;  %v1097_v7 = vld [vmem:[%s1440_s1 + $0xb0] sm:$0xff]   ;;  %v1101_v11 = vld [vmem:[%s1440_s1 + $0xa8] sm:$0xff]  }
   0x5   :  { %992 = vmatpush3.bf16.msra.mxu1 %v1093_v3  ;;  %971 = vmatprep.subr.bf16.mxu0 %v1094_v4  ;;  %v1102_v12 = vld [vmem:[%s1440_s1 + $0x60] sm:$0xff]   ;;  %v1106_v16 = vld [vmem:[%s1440_s1 + $0x58] sm:$0xff]   ;;  %v1110_v20 = vld [vmem:[%s1440_s1 + $0x50] sm:$0xff]   ;;  %v1287_v37 = vsub.s32 %v171_v31, %v173_v32 }
   0x6   :  { %993 = vmatprep.subr.bf16.mxu1 %v1095_v5  ;;  %v1103_v13 = vld [vmem:[%s1440_s1 + $0xe0] sm:$0xff]   ;;  %v1107_v17 = vld [vmem:[%s1440_s1 + $0xd8] sm:$0xff]   ;;  %v1111_v21 = vld [vmem:[%s1440_s1 + $0xd0] sm:$0xff]  }
   0x7   :  { %v1104_v14 = vld [vmem:[%s1440_s1 + $0x20] sm:$0xff]   ;;  %v1108_v18 = vld [vmem:[%s1440_s1 + $0x18] sm:$0xff]   ;;  %v1112_v22 = vld [vmem:[%s1440_s1 + $0x10] sm:$0xff]  }
   0x8   :  { %972 = vmatpush3.bf16.msra.mxu0 %v1096_v6  ;;  %v1105_v15 = vld [vmem:[%s1440_s1 + $0xa0] sm:$0xff]   ;;  %v1109_v19 = vld [vmem:[%s1440_s1 + $0x98] sm:$0xff]   ;;  %v1113_v23 = vld [vmem:[%s1440_s1 + $0x90] sm:$0xff]  }
   0x9   :  { %994 = vmatpush3.bf16.msra.mxu1 %v1097_v7  ;;  %973 = vmatprep.subr.bf16.mxu0 %v1098_v8  ;;  %v1114_v27 = vld [vmem:[%s1440_s1 + $0x48] sm:$0xff]   ;;  %v1118_v33 = vld [vmem:[%s1440_s1 + $0x40] sm:$0xff]   ;;  %v1122_v43 = vld [vmem:[%s1440_s1 + $0x178] sm:$0xff]  }
   0xa   :  { %995 = vmatprep.subr.bf16.mxu1 %v1099_v9  ;;  %v1115_v28 = vld [vmem:[%s1440_s1 + $0xc8] sm:$0xff]   ;;  %v1119_v34 = vld [vmem:[%s1440_s1 + $0xc0] sm:$0xff]   ;;  %v1124_v46 = vld [vmem:[%s1440_s1 + $0x1f8] sm:$0xff]  }
   0xb   :  { %v1116_v29 = vld [vmem:[%s1440_s1 + $0x8] sm:$0xff]   ;;  %v1120_v35 = vld [vmem:[%s1440_s1] sm:$0xff]   ;;  %v1123_v53 = vld [vmem:[%s1440_s1 + $0x138] sm:$0xff]  }
   0xc   :  { %974 = vmatpush3.bf16.msra.mxu0 %v1100_v10  ;;  %v1117_v30 = vld [vmem:[%s1440_s1 + $0x88] sm:$0xff]   ;;  %v1121_v36 = vld [vmem:[%s1440_s1 + $0x80] sm:$0xff]   ;;  %v1126_v56 = vld [vmem:[%s1440_s1 + $0x170] sm:$0xff]  }
   0xd   :  { %996 = vmatpush3.bf16.msra.mxu1 %v1101_v11  ;;  %975 = vmatprep.subr.bf16.mxu0 %v1102_v12  ;;  %v18_v38 = vld [vmem:[%s1441_s0] sm:$0xff]  ;;  %v19_v39 = vld [vmem:[%s1441_s0 + $0x8] sm:$0x1]  ;;  %v1125_v58 = vld [vmem:[%s1440_s1 + $0x1b8] sm:$0xff]  }
   0xe   :  { %997 = vmatprep.subr.bf16.mxu1 %v1103_v13  ;;  %v20_v41 = vmax.bf16 %v1163_v40, %v18_v38  ;;  %v21_v42 = vmax.bf16 %v1163_v40, %v19_v39  ;;  %v1128_v60 = vld [vmem:[%s1440_s1 + $0x1f0] sm:$0xff]   ;;  %v1130_v63 = vld [vmem:[%s1440_s1 + $0x168] sm:$0xff]   ;;  %v1134_v3 = vld [vmem:[%s1440_s1 + $0x160] sm:$0xff]  }
   0xf   :  { %v1127_v61 = vld [vmem:[%s1440_s1 + $0x130] sm:$0xff]   ;;  %v1132_v1 = vld [vmem:[%s1440_s1 + $0x1e8] sm:$0xff]   ;;  %v1136_v5 = vld [vmem:[%s1440_s1 + $0x1e0] sm:$0xff]  }
  0x10   :  { %976 = vmatpush3.bf16.msra.mxu0 %v1104_v14  ;;  %v168_v44 = vcombine.high %v20_v41, %v20_v41  ;;  %v175_v45 = vrot.slane %v20_v41, %v1287_v37  ;;  %v223_v47 = vrot.slane %v21_v42, %v1287_v37  ;;  %v1129_v0 = vld [vmem:[%s1440_s1 + $0x1b0] sm:$0xff]   ;;  %v1131_v2 = vld [vmem:[%s1440_s1 + $0x128] sm:$0xff]   ;;  %v1135_v6 = vld [vmem:[%s1440_s1 + $0x120] sm:$0xff]  }
  0x11   :  { %998 = vmatpush3.bf16.msra.mxu1 %v1105_v15  ;;  %977 = vmatprep.subr.bf16.mxu0 %v1106_v16  ;;  %v1133_v4 = vld [vmem:[%s1440_s1 + $0x1a8] sm:$0xff]   ;;  %v1138_v7 = vld [vmem:[%s1440_s1 + $0x158] sm:$0xff]   ;;  %v1137_v8 = vld [vmem:[%s1440_s1 + $0x1a0] sm:$0xff]  }
  0x12   :  { %999 = vmatprep.subr.bf16.mxu1 %v1107_v17  ;;  %v183_v48 = vcombine.high %v175_v45, %v175_v45  ;;  %v191_v49 = vrot.slane %v175_v45, %v1287_v37  ;;  %v1305_v50 = vrot.slane %v168_v44, %v1287_v37  ;;  %v1308_v51 = vrot.slane %v223_v47, %v1287_v37  ;;  %v1140_v9 = vld [vmem:[%s1440_s1 + $0x1d8] sm:$0xff]   ;;  %v1142_v11 = vld [vmem:[%s1440_s1 + $0x150] sm:$0xff]   ;;  %v1146_v15 = vld [vmem:[%s1440_s1 + $0x148] sm:$0xff]  }
  0x13   :  { %v1139_v10 = vld [vmem:[%s1440_s1 + $0x118] sm:$0xff]   ;;  %v1144_v13 = vld [vmem:[%s1440_s1 + $0x1d0] sm:$0xff]   ;;  %v1148_v17 = vld [vmem:[%s1440_s1 + $0x1c8] sm:$0xff]  }
  0x14   :  { %978 = vmatpush3.bf16.msra.mxu0 %v1108_v18  ;;  %v205_v52 = vrot.slane %v183_v48, %v1287_v37  ;;  %v184_v54 = vcombine.high %v1305_v50, %v1305_v50  ;;  %v213_v55 = vcombine.high %v191_v49, %v191_v49  ;;  %v1141_v12 = vld [vmem:[%s1440_s1 + $0x198] sm:$0xff]   ;;  %v1143_v14 = vld [vmem:[%s1440_s1 + $0x110] sm:$0xff]   ;;  %v1147_v18 = vld [vmem:[%s1440_s1 + $0x108] sm:$0xff]  }
  0x15   :  { %1000 = vmatpush3.bf16.msra.mxu1 %v1109_v19  ;;  %979 = vmatprep.subr.bf16.mxu0 %v1110_v20  ;;  %v1145_v16 = vld [vmem:[%s1440_s1 + $0x190] sm:$0xff]   ;;  %v1150_v19 = vld [vmem:[%s1440_s1 + $0x140] sm:$0xff]   ;;  %v1149_v20 = vld [vmem:[%s1440_s1 + $0x188] sm:$0xff]  }
  0x16   :  { %1001 = vmatprep.subr.bf16.mxu1 %v1111_v21  ;;  %704 = vmatprep.mubr.bf16.mxu0 %v205_v52  ;;  %v215_v57 = vcombine.high %v205_v52, %v205_v52  ;;  %v212_v59 = vrot.slane %v184_v54, %v1287_v37  ;;  %v1152_v21 = vld [vmem:[%s1440_s1 + $0x1c0] sm:$0xff]   ;;  %v1154_v25 = vld [vmem:[%s1440_s1 + $0x238] sm:$0xff]   ;;  %v1159_v32 = vld [vmem:[%s1440_s1 + $0x210] sm:$0xff]  }
  0x17   :  { %v1153_v24 = vld [vmem:[%s1440_s1 + $0x180] sm:$0xff]   ;;  %v1158_v31 = vld [vmem:[%s1440_s1 + $0x218] sm:$0xff]  }
  0x18   :  { %980 = vmatpush3.bf16.msra.mxu0 %v1112_v22  ;;  %744 = vmatprep.mubr.bf16.mxu1 %v215_v57  ;;  %v216_v62 = vcombine.high %v212_v59, %v212_v59  ;;  %v1151_v22 = vld [vmem:[%s1440_s1 + $0x100] sm:$0xff]  }
  0x19   :  { %1002 = vmatpush3.bf16.msra.mxu1 %v1113_v23  ;;  %981 = vmatprep.subr.bf16.mxu0 %v1114_v27  ;;  %v198_v23 = vrot.slane %v1305_v50, %v1287_v37 }
  0x1a   :  { %1003 = vmatprep.subr.bf16.mxu1 %v1115_v28  ;;  %v1155_v28 = vld [vmem:[%s1440_s1 + $0x230] sm:$0xff]  }
  0x1b   :  { %v214_v27 = vcombine.high %v198_v23, %v198_v23 }
  0x1c   :  { %982 = vmatpush3.bf16.msra.mxu0 %v1116_v29  ;;  %v1156_v29 = vld [vmem:[%s1440_s1 + $0x228] sm:$0xff]  }
  0x1d   :  { %1004 = vmatpush3.bf16.msra.mxu1 %v1117_v30  ;;  %983 = vmatprep.subr.bf16.mxu0 %v1118_v33  ;;  %v1157_v30 = vld [vmem:[%s1440_s1 + $0x220] sm:$0xff]   ;;  %v1160_v33 = vld [vmem:[%s1440_s1 + $0x208] sm:$0xff]  }
  0x1e   :  { %1005 = vmatprep.subr.bf16.mxu1 %v1119_v34  ;;  %v1161_v34 = vld [vmem:[%s1440_s1 + $0x200] sm:$0xff]  }
  0x20   :  { %984 = vmatpush3.bf16.msra.mxu0 %v1120_v35 }
  0x21   :  { %1006 = vmatpush3.bf16.msra.mxu1 %v1121_v36  ;;  %1013 = vmatprep.subr.bf16.mxu0 %v1122_v43 }
  0x22   :  { %1035 = vmatprep.subr.bf16.mxu1 %v1124_v46 }
  0x23   :  { %705 = vmatmul.mubr.bf16.vlgmr.msra.gmra.mxu0 %v191_v49 }
  0x24   :  { %1014 = vmatpush3.bf16.msra.mxu0 %v1123_v53  ;;  %745 = vmatmul.mubr.bf16.vlgmr.msra.gmra.mxu1 %v213_v55 }
  0x25   :  { %1015 = vmatprep.subr.bf16.mxu0 %v1126_v56  ;;  %1036 = vmatpush3.bf16.msra.mxu1 %v1125_v58 }
  0x26   :  { %784 = vmatprep.mubr.bf16.mxu0 %v212_v59  ;;  %1037 = vmatprep.subr.bf16.mxu1 %v1128_v60  ;;  %v967_v59 = vld [vmem:[%s1442_s2] ss:$0 sm:$0xff] }
  0x27   :  { %824 = vmatprep.mubr.bf16.mxu1 %v216_v62 }
  0x28   :  { %1016 = vmatpush3.bf16.msra.mxu0 %v1127_v61  ;;  %v968_v61 = vld [vmem:[%s1443_s3] ss:$0 sm:$0xff] }
  0x29   :  { %1017 = vmatprep.subr.bf16.mxu0 %v1130_v63  ;;  %1038 = vmatpush3.bf16.msra.mxu1 %v1129_v0 }
  0x2a   :  { %1039 = vmatprep.subr.bf16.mxu1 %v1132_v1 }
  0x2c   :  { %1018 = vmatpush3.bf16.msra.mxu0 %v1131_v2 }
  0x2d   :  { %1019 = vmatprep.subr.bf16.mxu0 %v1134_v3  ;;  %1040 = vmatpush3.bf16.msra.mxu1 %v1133_v4 }
  0x2e   :  { %1041 = vmatprep.subr.bf16.mxu1 %v1136_v5 }
  0x30   :  { %1020 = vmatpush3.bf16.msra.mxu0 %v1135_v6 }
  0x31   :  { %1021 = vmatprep.subr.bf16.mxu0 %v1138_v7  ;;  %1042 = vmatpush3.bf16.msra.mxu1 %v1137_v8 }
  0x32   :  { %1043 = vmatprep.subr.bf16.mxu1 %v1140_v9 }
  0x34   :  { %1022 = vmatpush3.bf16.msra.mxu0 %v1139_v10 }
  0x35   :  { %1023 = vmatprep.subr.bf16.mxu0 %v1142_v11  ;;  %1044 = vmatpush3.bf16.msra.mxu1 %v1141_v12 }
  0x36   :  { %1045 = vmatprep.subr.bf16.mxu1 %v1144_v13 }
  0x38   :  { %1024 = vmatpush3.bf16.msra.mxu0 %v1143_v14 }
  0x39   :  { %1025 = vmatprep.subr.bf16.mxu0 %v1146_v15  ;;  %1046 = vmatpush3.bf16.msra.mxu1 %v1145_v16 }
  0x3a   :  { %1047 = vmatprep.subr.bf16.mxu1 %v1148_v17 }
  0x3c   :  { %1026 = vmatpush3.bf16.msra.mxu0 %v1147_v18 }
  0x3d   :  { %1027 = vmatprep.subr.bf16.mxu0 %v1150_v19  ;;  %1048 = vmatpush3.bf16.msra.mxu1 %v1149_v20 }
  0x3e   :  { %1049 = vmatprep.subr.bf16.mxu1 %v1152_v21 }
  0x40   :  { %1028 = vmatpush3.bf16.msra.mxu0 %v1151_v22 }
  0x41   :  { %1066 = vmatprep.subr.bf16.mxu0 %v1164_v26  ;;  %1050 = vmatpush3.bf16.msra.mxu1 %v1153_v24 }
  0x43   :  { %785 = vmatmul.mubr.bf16.vlgmr.msra.gmra.mxu0 %v198_v23 }
  0x44   :  { %1067 = vmatpush3.bf16.msra.mxu0 %v1154_v25  ;;  %1082 = vmatprep.mubr.msk.bf16.mxu0 %vm1165_vm0, %v1164_v26 }
  0x45   :  { %825 = vmatmul.mubr.bf16.vlgmr.msra.gmra.mxu1 %v214_v27  ;;  %1068 = vmatprep.subr.bf16.mxu0 %v1164_v26 }
  0x48   :  { %1069 = vmatpush3.bf16.msra.mxu0 %v1155_v28 }
  0x49   :  { %1070 = vmatprep.subr.bf16.mxu0 %v1164_v26 }
  0x4c   :  { %1071 = vmatpush3.bf16.msra.mxu0 %v1156_v29 }
  0x4d   :  { %1072 = vmatprep.subr.bf16.mxu0 %v1164_v26 }
  0x50   :  { %1073 = vmatpush3.bf16.msra.mxu0 %v1157_v30 }
  0x51   :  { %1074 = vmatprep.subr.bf16.mxu0 %v1164_v26 }
  0x54   :  { %1075 = vmatpush3.bf16.msra.mxu0 %v1158_v31 }
  0x55   :  { %1076 = vmatprep.subr.bf16.mxu0 %v1164_v26 }
  0x58   :  { %1077 = vmatpush3.bf16.msra.mxu0 %v1159_v32 }
  0x59   :  { %1078 = vmatprep.subr.bf16.mxu0 %v1164_v26 }
  0x5c   :  { %1079 = vmatpush3.bf16.msra.mxu0 %v1160_v33 }
  0x5d   :  { %1080 = vmatprep.subr.bf16.mxu0 %v1164_v26 }
  0x60   :  { %1081 = vmatpush3.bf16.msra.mxu0 %v1161_v34 }
  0x63   :  { %1083 = vmatmul.mubr.bf16.vlgmr.msra.gmra.mxu0 %v1308_v51 }
  0xe3   :  { %v985_v35 = vpop.f32.mrf.mxu0 }
  0xe4   :  { %v1007_v36 = vpop.f32.mrf.mxu1 }
  0xe5   :  { %v986_v37 = vpop.f32.mrf.mxu0 }
  0xe6   :  { %v1008_v38 = vpop.f32.mrf.mxu1  ;;  %v987_v52 = vadd.f32 %v986_v37, %v985_v35 }
  0xe7   :  { %v988_v39 = vpop.f32.mrf.mxu0  ;;  %v1009_v53 = vadd.f32 %v1008_v38, %v1007_v36 }
  0xe8   :  { %v1010_v41 = vpop.f32.mrf.mxu1 }
  0xe9   :  { %v989_v40 = vpop.f32.mrf.mxu0  ;;  %v747_v51 = vadd.f32 %v1009_v53, %v987_v52 }
  0xea   :  { %v1011_v42 = vpop.f32.mrf.mxu1 }
 0x103   :  { %v1029_v43 = vpop.f32.mrf.mxu0 }
 0x105   :  { %v1030_v44 = vpop.f32.mrf.mxu0  ;;  %v1051_v45 = vpop.f32.mrf.mxu1 }
 0x106   :  { %v1031_v54 = vadd.f32 %v1030_v44, %v1029_v43 }
 0x107   :  { %v1032_v46 = vpop.f32.mrf.mxu0  ;;  %v1052_v47 = vpop.f32.mrf.mxu1 }
 0x108   :  { %v787_v55 = vadd.f32 %v1031_v54, %v747_v51  ;;  %v1053_v56 = vadd.f32 %v1052_v47, %v1051_v45 }
 0x109   :  { %v1033_v48 = vpop.f32.mrf.mxu0  ;;  %v1054_v49 = vpop.f32.mrf.mxu1 }
 0x10a   :  { %v827_v57 = vadd.f32 %v1053_v56, %v787_v55 }
 0x10b   :  { %v1055_v50 = vpop.f32.mrf.mxu1 }
 0x123   :  { %v866_v58 = vpop.f32.mrf.mxu0 }
 0x124   :  { %v867_v60 = vadd.f32 %v866_v58, %v827_v57 }
 0x125   :  { %v1084_v62 = vpop.f32.mrf.mxu0 }
 0x126   :  { %v879_v63 = vmul.f32 %v967_v59, %v867_v60 }
 0x127   :  { %v869_v0 = vpop.f32.mrf.mxu0 }
 0x128   :  { %v887_v1 = vadd.f32 %v968_v61, %v879_v63 }
 0x129   :  { %v1085_v2 = vpop.f32.mrf.mxu0 }
 0x12a   :  { %v888_v3 = vmax.f32 %v887_v1, 0.0 }
 0x12c   :  { %v889_v4 = vpack.c.bf16 %v888_v3, %v888_v3 }
 0x12e   :  { %890 = vst [vmem:[%s1444_s4] sm:$0x1] %v889_v4 }

// kernel: _lambda_.11
= control target key start
LH: loop header
LB: loop body
LE: loop exit
PB: predicated region body
PF: predicated region fallthrough
CT: control target
= control target key end

     0   :  { %v200_v0 = vmov 0.0   ;;  %vm201_vm0 = vmmov 0   ;;  %s271_s1 = inlined_call_operand.vmem [shape: bf16[128,128], index: 1, kind: input, shape index: {}]   ;;  %s272_s0 = inlined_call_operand.vmem [shape: bf16[2,128], index: 0, kind: input, shape index: {}]   ;;  %s273_s2 = inlined_call_operand.vmem [shape: f32[1,128], index: 2, kind: input, shape index: {}]   ;;  %s274_s4 = inlined_call_operand.vmem [shape: bf16[2,128], index: 4, kind: input, shape index: {}]   ;;  %s275_s3 = inlined_call_operand.vmem [shape: f32[1,128], index: 3, kind: input, shape index: {}]   ;;  %s276_s5 = inlined_call_operand.vmem [shape: bf16[2,128], index: 5, kind: output, shape index: {}]  }
   0x1   :  { %170 = vmatprep.subr.bf16.mxu0 %v200_v0  ;;  %v192_v1 = vld [vmem:[%s271_s1 + $0x38] sm:$0xff]   ;;  %186 = vmatprep.mubr.msk.bf16.mxu0 %vm201_vm0, %v200_v0  ;;  %v193_v2 = vld [vmem:[%s271_s1 + $0x30] sm:$0xff]   ;;  %v194_v3 = vld [vmem:[%s271_s1 + $0x28] sm:$0xff]  }
   0x2   :  { %171 = vmatpush3.bf16.msra.mxu0 %v192_v1  ;;  %v195_v4 = vld [vmem:[%s271_s1 + $0x20] sm:$0xff]   ;;  %v196_v5 = vld [vmem:[%s271_s1 + $0x18] sm:$0xff]   ;;  %v197_v6 = vld [vmem:[%s271_s1 + $0x10] sm:$0xff]  }
   0x3   :  { %172 = vmatprep.subr.bf16.mxu0 %v200_v0  ;;  %v198_v7 = vld [vmem:[%s271_s1 + $0x8] sm:$0xff]   ;;  %v199_v8 = vld [vmem:[%s271_s1] sm:$0xff]  }
   0x4   :  { %v21_v9 = vld [vmem:[%s272_s0] sm:$0x1] }
   0x5   :  { %v159_v10 = vld [vmem:[%s273_s2] ss:$0 sm:$0xff] }
   0x6   :  { %173 = vmatpush3.bf16.msra.mxu0 %v193_v2  ;;  %v142_v11 = vld [vmem:[%s274_s4] sm:$0x1] }
   0x7   :  { %174 = vmatprep.subr.bf16.mxu0 %v200_v0  ;;  %v160_v13 = vld [vmem:[%s275_s3] ss:$0 sm:$0xff]  ;;  %v143_v15 = vunpack.c.l.bf16 %v142_v11 }
   0xa   :  { %175 = vmatpush3.bf16.msra.mxu0 %v194_v3 }
   0xb   :  { %176 = vmatprep.subr.bf16.mxu0 %v200_v0 }
   0xe   :  { %177 = vmatpush3.bf16.msra.mxu0 %v195_v4 }
   0xf   :  { %178 = vmatprep.subr.bf16.mxu0 %v200_v0 }
  0x12   :  { %179 = vmatpush3.bf16.msra.mxu0 %v196_v5 }
  0x13   :  { %180 = vmatprep.subr.bf16.mxu0 %v200_v0 }
  0x16   :  { %181 = vmatpush3.bf16.msra.mxu0 %v197_v6 }
  0x17   :  { %182 = vmatprep.subr.bf16.mxu0 %v200_v0 }
  0x1a   :  { %183 = vmatpush3.bf16.msra.mxu0 %v198_v7 }
  0x1b   :  { %184 = vmatprep.subr.bf16.mxu0 %v200_v0 }
  0x1e   :  { %185 = vmatpush3.bf16.msra.mxu0 %v199_v8 }
  0x21   :  { %187 = vmatmul.mubr.bf16.vlgmr.msra.gmra.mxu0 %v21_v9 }
  0xe1   :  { %v120_v12 = vpop.f32.mrf.mxu0 }
  0xe2   :  { %v133_v14 = vmul.f32 %v159_v10, %v120_v12 }
  0xe3   :  { %v188_v16 = vpop.f32.mrf.mxu0 }
  0xe4   :  { %v141_v17 = vadd.f32 %v160_v13, %v133_v14 }
  0xe5   :  { %v123_v18 = vpop.f32.mrf.mxu0 }
  0xe6   :  { %v144_v19 = vadd.f32 %v143_v15, %v141_v17 }
  0xe7   :  { %v189_v20 = vpop.f32.mrf.mxu0 }
  0xe8   :  { %v145_v21 = vpack.c.bf16 %v144_v19, %v144_v19 }
  0xea   :  { %146 = vst [vmem:[%s276_s5] sm:$0x1] %v145_v21 }

// kernel: _lambda_.13
= control target key start
LH: loop header
LB: loop body
LE: loop exit
PB: predicated region body
PF: predicated region fallthrough
CT: control target
= control target key end

     0   :  { %v199_v0 = vmov 0.0   ;;  %vm200_vm0 = vmmov 0   ;;  %s270_s1 = inlined_call_operand.vmem [shape: bf16[128,128], index: 1, kind: input, shape index: {}]   ;;  %s271_s0 = inlined_call_operand.vmem [shape: bf16[2,128], index: 0, kind: input, shape index: {}]   ;;  %s272_s2 = inlined_call_operand.vmem [shape: f32[1,128], index: 2, kind: input, shape index: {}]   ;;  %s273_s4 = inlined_call_operand.vmem [shape: bf16[2,128], index: 4, kind: input, shape index: {}]   ;;  %s274_s3 = inlined_call_operand.vmem [shape: f32[1,128], index: 3, kind: input, shape index: {}]   ;;  %s275_s5 = inlined_call_operand.vmem [shape: f32[2,128], index: 5, kind: output, shape index: {}]  }
   0x1   :  { %169 = vmatprep.subr.bf16.mxu0 %v199_v0  ;;  %v191_v1 = vld [vmem:[%s270_s1 + $0x38] sm:$0xff]   ;;  %185 = vmatprep.mubr.msk.bf16.mxu0 %vm200_vm0, %v199_v0  ;;  %v192_v2 = vld [vmem:[%s270_s1 + $0x30] sm:$0xff]   ;;  %v193_v3 = vld [vmem:[%s270_s1 + $0x28] sm:$0xff]  }
   0x2   :  { %170 = vmatpush3.bf16.msra.mxu0 %v191_v1  ;;  %v194_v4 = vld [vmem:[%s270_s1 + $0x20] sm:$0xff]   ;;  %v195_v5 = vld [vmem:[%s270_s1 + $0x18] sm:$0xff]   ;;  %v196_v6 = vld [vmem:[%s270_s1 + $0x10] sm:$0xff]  }
   0x3   :  { %171 = vmatprep.subr.bf16.mxu0 %v199_v0  ;;  %v197_v7 = vld [vmem:[%s270_s1 + $0x8] sm:$0xff]   ;;  %v198_v8 = vld [vmem:[%s270_s1] sm:$0xff]  }
   0x4   :  { %v21_v9 = vld [vmem:[%s271_s0] sm:$0x1] }
   0x5   :  { %v158_v10 = vld [vmem:[%s272_s2] ss:$0 sm:$0xff] }
   0x6   :  { %172 = vmatpush3.bf16.msra.mxu0 %v192_v2  ;;  %v142_v11 = vld [vmem:[%s273_s4] sm:$0x1] }
   0x7   :  { %173 = vmatprep.subr.bf16.mxu0 %v199_v0  ;;  %v159_v13 = vld [vmem:[%s274_s3] ss:$0 sm:$0xff]  ;;  %v143_v15 = vunpack.c.l.bf16 %v142_v11 }
   0xa   :  { %174 = vmatpush3.bf16.msra.mxu0 %v193_v3 }
   0xb   :  { %175 = vmatprep.subr.bf16.mxu0 %v199_v0 }
   0xe   :  { %176 = vmatpush3.bf16.msra.mxu0 %v194_v4 }
   0xf   :  { %177 = vmatprep.subr.bf16.mxu0 %v199_v0 }
  0x12   :  { %178 = vmatpush3.bf16.msra.mxu0 %v195_v5 }
  0x13   :  { %179 = vmatprep.subr.bf16.mxu0 %v199_v0 }
  0x16   :  { %180 = vmatpush3.bf16.msra.mxu0 %v196_v6 }
  0x17   :  { %181 = vmatprep.subr.bf16.mxu0 %v199_v0 }
  0x1a   :  { %182 = vmatpush3.bf16.msra.mxu0 %v197_v7 }
  0x1b   :  { %183 = vmatprep.subr.bf16.mxu0 %v199_v0 }
  0x1e   :  { %184 = vmatpush3.bf16.msra.mxu0 %v198_v8 }
  0x21   :  { %186 = vmatmul.mubr.bf16.vlgmr.msra.gmra.mxu0 %v21_v9 }
  0xe1   :  { %v120_v12 = vpop.f32.mrf.mxu0 }
  0xe2   :  { %v133_v14 = vmul.f32 %v158_v10, %v120_v12 }
  0xe3   :  { %v187_v16 = vpop.f32.mrf.mxu0 }
  0xe4   :  { %v141_v17 = vadd.f32 %v159_v13, %v133_v14 }
  0xe5   :  { %v123_v18 = vpop.f32.mrf.mxu0 }
  0xe6   :  { %v144_v19 = vadd.f32 %v143_v15, %v141_v17 }
  0xe7   :  { %v188_v20 = vpop.f32.mrf.mxu0 }
  0xe8   :  { %145 = vst [vmem:[%s275_s5] sm:$0x3] %v144_v19 }

</bundles_post_ra>
